<compile_context>
chip_gen: v6e
topology: v6e:2x2x1
jax: 0.10.0
libtpu: 0.0.40
codegen_flags: <defaults>
</compile_context>

<pallas_src>
import functools

import jax
import jax.numpy as jnp
import numpy as np
from jax.experimental import pallas as pl
from jax.experimental.pallas import tpu as pltpu

LN_EPS = 1e-5


# ----------------------------------------------------------------------------- helpers
def _round_up(n, m):
    return ((n + m - 1) // m) * m


def _choose_tile(n, target):
    """Sequence tile: multiple of 8 (128-multiples preferred). Any N is handled by padding
    the sequence up to a tile multiple; padded KV columns are masked inside K2."""
    if n <= target:
        return max(8, _round_up(n, 8))
    if target >= 128:
        return (target // 128) * 128
    return max(8, (target // 8) * 8)


def _blk_bytes(shape, itemsize):
    """VMEM footprint of one block (minor dim padded to 128 lanes, second-minor to 8)."""
    s = list(shape)
    s[-1] = _round_up(s[-1], 128)
    if len(s) >= 2:
        s[-2] = _round_up(s[-2], 8)
    n = 1
    for d in s:
        n *= d
    return n * itemsize


def _vmem_limit(est_bytes):
    try:
        cap = pltpu.get_tpu_info().vmem_capacity_bytes
    except Exception:
        cap = 64 * 1024 * 1024
    return int(min(max(est_bytes, 32 * 1024 * 1024), int(0.9 * cap)))


def _layernorm(v, w, b, c_true, c_pad):
    """LayerNorm over the last (zero-padded) axis, centered-variance form.

    Padded channels of v are exactly zero, so their contribution to sum((v-mu)^2) is
    (c_pad - c_true) * mu^2, which is subtracted to recover the exact unpadded variance.
    Padded entries of w/b are zero, so padded output channels stay exactly zero.
    """
    inv_c = 1.0 / c_true
    mu = jnp.sum(v, axis=-1, keepdims=True) * inv_c
    d = v - mu
    ss = jnp.sum(d * d, axis=-1, keepdims=True)
    if c_pad != c_true:
        ss = ss - (c_pad - c_true) * (mu * mu)
    var = ss * inv_c
    return d * jax.lax.rsqrt(var + LN_EPS) * w + b


# ----------------------------------------------------------------------------- kernels
def _ln_qkv_kernel(x_ref, ln_w_ref, ln_b_ref, wq_ref, wk_ref, wv_ref,
                   q_ref, k_ref, v_ref, *, c_true, c_pad, num_heads, head_dim):
    x = x_ref[0]                                                   # (TQ, Cp) f32
    xn = _layernorm(x, ln_w_ref[0], ln_b_ref[0], c_true, c_pad)
    xn_b = xn.astype(jnp.bfloat16)                                 # bf16 MXU operands
    q = jnp.dot(xn_b, wq_ref[...], preferred_element_type=jnp.float32)  # scale folded in wq
    k = jnp.dot(xn_b, wk_ref[...], preferred_element_type=jnp.float32)
    v = jnp.dot(xn_b, wv_ref[...], preferred_element_type=jnp.float32)
    qb = q.astype(q_ref.dtype)
    kb = k.astype(k_ref.dtype)
    vb = v.astype(v_ref.dtype)
    # Head-major stores (static unroll): K2 gets (H, T, D) blocks with no HBM transpose.
    for h in range(num_heads):
        sl = slice(h * head_dim, (h + 1) * head_dim)
        q_ref[0, h] = qb[:, sl]
        k_ref[0, h] = kb[:, sl]
        v_ref[0, h] = vb[:, sl]


def _flash_attn_kernel(q_ref, k_ref, v_ref, o_ref, m_sc, l_sc, acc_sc,
                       *, n_true, tk, c_true, c_pad, num_heads, padded_n):
    # TODO(synk): optional attention mask / cross-attention (y != x) path is not implemented
    # (the default forward uses mask=None, y=None).
    j = pl.program_id(2)

    @pl.when(j == 0)
    def _():
        m_sc[...] = jnp.full(m_sc.shape, -jnp.inf, dtype=jnp.float32)
        l_sc[...] = jnp.zeros(l_sc.shape, dtype=jnp.float32)
        acc_sc[...] = jnp.zeros(acc_sc.shape, dtype=jnp.float32)

    q = q_ref[0]                                                   # (H, TQ, D) bf16
    k = k_ref[0]                                                   # (H, TK, D) bf16
    v = v_ref[0]                                                   # (H, TK, D) bf16

    s = jnp.einsum("hqd,hkd->hqk", q, k,
                   preferred_element_type=jnp.float32)             # (H, TQ, TK) f32
    if padded_n:
        kv_idx = j * tk + jax.lax.broadcasted_iota(jnp.int32, s.shape, 2)
        s = jnp.where(kv_idx < n_true, s, -jnp.inf)

    m_prev = m_sc[...]
    m_new = jnp.maximum(m_prev, jnp.max(s, axis=-1, keepdims=True))
    alpha = jnp.exp(m_prev - m_new)
    p = jnp.exp(s - m_new)
    l_sc[...] = alpha * l_sc[...] + jnp.sum(p, axis=-1, keepdims=True)
    acc_sc[...] = alpha * acc_sc[...] + jnp.einsum(
        "hqk,hkd->hqd", p.astype(v.dtype), v, preferred_element_type=jnp.float32)
    m_sc[...] = m_new

    @pl.when(j == pl.num_programs(2) - 1)
    def _():
        # approx reciprocal: EUP slot, ~1e-3 rel error in probabilities (inference use).
        ctx = acc_sc[...] * pl.reciprocal(l_sc[...], approx=True)  # (H, TQ, D) f32
        flat = jnp.concatenate([ctx[h] for h in range(num_heads)], axis=-1)  # (TQ, C)
        flat = flat.astype(o_ref.dtype)
        if c_pad > c_true:
            flat = jnp.concatenate(
                [flat, jnp.zeros((flat.shape[0], c_pad - c_true), o_ref.dtype)], axis=-1)
        o_ref[0] = flat                                            # lane-dense (TQ, Cp)


def _proj_mlp_kernel(x_ref, ctx_ref, wp_ref, bp_ref, ln_w_ref, ln_b_ref,
                     w1_ref, b1_ref, w2_ref, b2_ref, o_ref, *, c_true, c_pad):
    x = x_ref[0]                                                   # (TQ, Cp) f32
    attn = jnp.dot(ctx_ref[0], wp_ref[...],
                   preferred_element_type=jnp.float32) + bp_ref[0]
    x1 = x + attn                                                  # residual 1 (f32)
    xn2 = _layernorm(x1, ln_w_ref[0], ln_b_ref[0], c_true, c_pad)
    h = jnp.dot(xn2.astype(jnp.bfloat16), w1_ref[...],
                preferred_element_type=jnp.float32) + b1_ref[0]
    h = jnp.maximum(h, 0.0)                                        # ReLU (dropout = id)
    h2 = jnp.dot(h.astype(jnp.bfloat16), w2_ref[...],
                 preferred_element_type=jnp.float32) + b2_ref[0]
    o_ref[0] = (x1 + h2).astype(o_ref.dtype)                       # residual 2


# ----------------------------------------------------------------------------- param prep
def prepare_params(params, num_heads):
    """Pad / cast / fold-scale the weights once (hoisted out of the per-call path)."""
    f32, bf16 = jnp.float32, jnp.bfloat16
    C = params["wq"].shape[0]
    assert C % num_heads == 0
    head_dim = C // num_heads
    scale = float(head_dim) ** -0.5
    c_pad = _round_up(C, 128)
    hidden = params["w1"].shape[1]
    hid_pad = _round_up(hidden, 128)

    def pad2(a, rows, cols, dtype):
        a = jnp.asarray(a, f32)
        return jnp.pad(a, ((0, rows - a.shape[0]), (0, cols - a.shape[1]))).astype(dtype)

    def pad_row(a, cols):
        a = jnp.asarray(a, f32)
        return jnp.pad(a, ((0, cols - a.shape[0]),)).reshape(1, cols)

    wkv = jnp.asarray(params["wkv"], f32)
    return {
        "ln1_w": pad_row(params["ln1_w"], c_pad),
        "ln1_b": pad_row(params["ln1_b"], c_pad),
        # softmax scale folded into the (bias-free) query projection
        "wq": pad2(jnp.asarray(params["wq"], f32) * scale, c_pad, C, bf16),
        "wk": pad2(wkv[:, :C], c_pad, C, bf16),
        "wv": pad2(wkv[:, C:], c_pad, C, bf16),
        "wp": pad2(params["wp"], c_pad, c_pad, bf16),
        "bp": pad_row(params["bp"], c_pad),
        "ln2_w": pad_row(params["ln2_w"], c_pad),
        "ln2_b": pad_row(params["ln2_b"], c_pad),
        "w1": pad2(params["w1"], c_pad, hid_pad, bf16),
        "b1": pad_row(params["b1"], hid_pad),
        "w2": pad2(params["w2"], hid_pad, c_pad, bf16),
        "b2": pad_row(params["b2"], c_pad),
    }


# ----------------------------------------------------------------------------- forward
def _forward(x, prep, *, num_heads, block_seq, single_buffer_weights):
    B, N, C = x.shape
    assert C % num_heads == 0
    D = C // num_heads
    c_pad = prep["wq"].shape[0]
    hid_pad = prep["w1"].shape[1]
    f32, bf16 = jnp.float32, jnp.bfloat16

    # Sequence tiles (TQ == TK). With flash KV tiling VMEM is bounded by the tiles, so the
    # same block_seq=256 default is safe for v5e/v6e (128 MiB) and v7x (64 MiB).
    T = _choose_tile(N, block_seq)
    n_pad = _round_up(N, T)
    n_tiles = n_pad // T
    padded_n = n_pad != N

    x_p = x.astype(f32)
    if padded_n or c_pad != C:
        x_p = jnp.pad(x_p, ((0, 0), (0, n_pad - N), (0, c_pad - C)))

    def act_spec():
        return pl.BlockSpec((1, T, c_pad), lambda b, s: (b, s, 0))

    def head_spec(index_map):
        return pl.BlockSpec((1, num_heads, T, D), index_map)

    def w_spec(shape):
        ndim = len(shape)
        imap = lambda *args, _nd=ndim: (0,) * _nd
        if single_buffer_weights:
            return pl.BlockSpec(shape, imap, pipeline_mode=pl.Buffered(1))
        return pl.BlockSpec(shape, imap)

    wbuf = 1 if single_buffer_weights else 2
    BF, F = 2, 4

    # ================= K1: LayerNorm1 + Q/K/V projection (head-major outputs) =============
    est1 = (2 * _blk_bytes((T, c_pad), F)                        # x block, double buffered
            + 3 * 2 * _blk_bytes((num_heads, T, D), BF)          # q/k/v output blocks
            + wbuf * (2 * _blk_bytes((1, c_pad), F)
                      + 3 * _blk_bytes((c_pad, C), BF))          # ln params + weights
            + 8 * _blk_bytes((T, c_pad), F))                     # f32 intermediates
    q, k, v = pl.pallas_call(
        functools.partial(_ln_qkv_kernel, c_true=C, c_pad=c_pad,
                          num_heads=num_heads, head_dim=D),
        out_shape=tuple(jax.ShapeDtypeStruct((B, num_heads, n_pad, D), bf16)
                        for _ in range(3)),
        grid_spec=pltpu.PrefetchScalarGridSpec(
            num_scalar_prefetch=0,
            grid=(B, n_tiles),
            in_specs=[act_spec(),
                      w_spec((1, c_pad)), w_spec((1, c_pad)),
                      w_spec((c_pad, C)), w_spec((c_pad, C)), w_spec((c_pad, C))],
            out_specs=[head_spec(lambda b, s: (b, 0, s, 0))] * 3,
        ),
        compiler_params=pltpu.CompilerParams(
            dimension_semantics=("parallel", "parallel"),
            vmem_limit_bytes=_vmem_limit(est1)),
    )(x_p, prep["ln1_w"], prep["ln1_b"], prep["wq"], prep["wk"], prep["wv"])

    # ================== K2: flash attention (KV-tiled online softmax) =====================
    est2 = (3 * 2 * _blk_bytes((num_heads, T, D), BF)            # q/k/v blocks
            + 2 * _blk_bytes((T, c_pad), BF)                     # lane-dense ctx output
            + 2 * _blk_bytes((num_heads, T, 1), F)               # m/l scratch
            + _blk_bytes((num_heads, T, D), F)                   # acc scratch
            + 5 * _blk_bytes((num_heads, T, T), F))              # scores / probs (f32)
    ctx = pl.pallas_call(
        functools.partial(_flash_attn_kernel, n_true=N, tk=T, c_true=C, c_pad=c_pad,
                          num_heads=num_heads, padded_n=padded_n),
        out_shape=jax.ShapeDtypeStruct((B, n_pad, c_pad), bf16),
        grid_spec=pltpu.PrefetchScalarGridSpec(
            num_scalar_prefetch=0,
            grid=(B, n_tiles, n_tiles),
            in_specs=[head_spec(lambda b, i, j: (b, 0, i, 0)),
                      head_spec(lambda b, i, j: (b, 0, j, 0)),
                      head_spec(lambda b, i, j: (b, 0, j, 0))],
            out_specs=pl.BlockSpec((1, T, c_pad), lambda b, i, j: (b, i, 0)),
            scratch_shapes=[pltpu.VMEM((num_heads, T, 1), jnp.float32),
                            pltpu.VMEM((num_heads, T, 1), jnp.float32),
                            pltpu.VMEM((num_heads, T, D), jnp.float32)],
        ),
        compiler_params=pltpu.CompilerParams(
            dimension_semantics=("parallel", "parallel", "arbitrary"),
            vmem_limit_bytes=_vmem_limit(est2)),
    )(q, k, v)

    # ========= K3: output projection + residual + LayerNorm2 + MLP + residual =============
    # TODO(synk): on v7x with large C (resident bf16 wp/w1/w2 approaching ~40 MiB), add a
    # hidden-dim reduction grid axis (or split K3 in two) instead of full weight residency.
    est3 = (2 * (2 * _blk_bytes((T, c_pad), F) + _blk_bytes((T, c_pad), BF))
            + wbuf * (_blk_bytes((c_pad, c_pad), BF)
                      + _blk_bytes((c_pad, hid_pad), BF)
                      + _blk_bytes((hid_pad, c_pad), BF)
                      + 2 * _blk_bytes((1, hid_pad), F)
                      + 4 * _blk_bytes((1, c_pad), F))
            + 4 * _blk_bytes((T, max(c_pad, hid_pad)), F))
    out = pl.pallas_call(
        functools.partial(_proj_mlp_kernel, c_true=C, c_pad=c_pad),
        out_shape=jax.ShapeDtypeStruct((B, n_pad, c_pad), x.dtype),
        grid_spec=pltpu.PrefetchScalarGridSpec(
            num_scalar_prefetch=0,
            grid=(B, n_tiles),
            in_specs=[act_spec(), act_spec(),
                      w_spec((c_pad, c_pad)), w_spec((1, c_pad)),
                      w_spec((1, c_pad)), w_spec((1, c_pad)),
                      w_spec((c_pad, hid_pad)), w_spec((1, hid_pad)),
                      w_spec((hid_pad, c_pad)), w_spec((1, c_pad))],
            out_specs=act_spec(),
        ),
        compiler_params=pltpu.CompilerParams(
            dimension_semantics=("parallel", "parallel"),
            vmem_limit_bytes=_vmem_limit(est3)),
    )(x_p, ctx, prep["wp"], prep["bp"], prep["ln2_w"], prep["ln2_b"],
      prep["w1"], prep["b1"], prep["w2"], prep["b2"])

    if padded_n or c_pad != C:
        out = out[:, :N, :C]
    return out


_FALLBACK_ERRORS = (TypeError, ValueError, NotImplementedError, pltpu.LoweringException)
try:
    _FALLBACK_ERRORS = _FALLBACK_ERRORS + (jax.errors.JaxRuntimeError,)
except AttributeError:
    pass


def make_transformer_layer(params, num_heads, *, block_seq=256):
    """Returns a jitted apply(x); padded/bf16 weights are prepared once (hoisted)."""
    prep = prepare_params(params, num_heads)

    def build(single_buffer_weights):
        return jax.jit(functools.partial(
            _forward, num_heads=num_heads, block_seq=block_seq,
            single_buffer_weights=single_buffer_weights))

    state = {"fwd": build(True), "retried": False}

    def apply(x):
        try:
            return state["fwd"](x, prep)
        except _FALLBACK_ERRORS as e:
            # Narrow fallback: only for environments where pipeline_mode=pl.Buffered(1) is
            # unsupported; never retry on VMEM/OOM (double-buffered weights use MORE VMEM).
            msg = str(e).lower()
            if state["retried"] or "vmem" in msg or "memory" in msg:
                raise
            state["retried"] = True
            state["fwd"] = build(False)
            return state["fwd"](x, prep)

    return apply


# ----------------------------------------------------------------------------- reference
def reference_transformer_layer(x, p, num_heads):
    """Pure-JAX (f32) mirror of the PyTorch forward (dropout=0, mask=None, y=None)."""
    B, N, C = x.shape
    d = C // num_heads

    def ln(v, w, b):
        mu = v.mean(-1, keepdims=True)
        var = ((v - mu) ** 2).mean(-1, keepdims=True)
        return (v - mu) / jnp.sqrt(var + LN_EPS) * w + b

    xn = ln(x, p["ln1_w"], p["ln1_b"])
    q = xn @ p["wq"]
    kv = xn @ p["wkv"]
    k, v = kv[..., :C], kv[..., C:]
    q = q.reshape(B, N, num_heads, d)
    k = k.reshape(B, N, num_heads, d)
    v = v.reshape(B, N, num_heads, d)
    att = jnp.einsum("bnhd,bmhd->bnmh", q, k) * (d ** -0.5)
    att = jax.nn.softmax(att, axis=2)
    out = jnp.einsum("bnmh,bmhd->bnhd", att, v).reshape(B, N, C)
    out = out @ p["wp"] + p["bp"]
    x = x + out
    xn2 = ln(x, p["ln2_w"], p["ln2_b"])
    h = jnp.maximum(xn2 @ p["w1"] + p["b1"], 0.0)
    return x + h @ p["w2"] + p["b2"]


# ----------------------------------------------------------------------------- test
if __name__ == "__main__":
    B, N = 2, 8
    dim_self = 32
    num_heads = 4
    mlp_ratio = 4.0
    hidden = int(dim_self * mlp_ratio)

    key = jax.random.PRNGKey(0)
    ks = jax.random.split(key, 16)

    # Weights stored in "x @ W" orientation (transposed vs. torch nn.Linear.weight).
    params = {
        "ln1_w": 1.0 + 0.05 * jax.random.normal(ks[0], (dim_self,), jnp.float32),
        "ln1_b": 0.05 * jax.random.normal(ks[1], (dim_self,), jnp.float32),
        "wq":  0.05 * jax.random.normal(ks[2], (dim_self, dim_self), jnp.float32),
        "wkv": 0.05 * jax.random.normal(ks[3], (dim_self, 2 * dim_self), jnp.float32),
        "wp":  0.05 * jax.random.normal(ks[4], (dim_self, dim_self), jnp.float32),
        "bp":  0.05 * jax.random.normal(ks[5], (dim_self,), jnp.float32),
        "ln2_w": 1.0 + 0.05 * jax.random.normal(ks[6], (dim_self,), jnp.float32),
        "ln2_b": 0.05 * jax.random.normal(ks[7], (dim_self,), jnp.float32),
        "w1": 0.05 * jax.random.normal(ks[8], (dim_self, hidden), jnp.float32),
        "b1": 0.05 * jax.random.normal(ks[9], (hidden,), jnp.float32),
        "w2": 0.05 * jax.random.normal(ks[10], (hidden, dim_self), jnp.float32),
        "b2": 0.05 * jax.random.normal(ks[11], (dim_self,), jnp.float32),
    }

    x = jax.random.normal(ks[12], (B, N, dim_self), jnp.float32)

    layer = make_transformer_layer(params, num_heads)
    out = jax.block_until_ready(layer(x))

    ref = jax.block_until_ready(reference_transformer_layer(x, params, num_heads))
    # bf16 MXU operands + approx softmax reciprocal => relaxed tolerance vs. f32 reference.
    np.testing.assert_allclose(np.asarray(out), np.asarray(ref), rtol=2e-2, atol=2e-2)

    print("KERNEL_OK")
</pallas_src>

<mosaic_0001>
module attributes {stable_mosaic.version = 11 : i64} {
  func.func @_ln_qkv_kernel(%arg0: i32, %arg1: i32, %arg2: memref<1x8x128xf32, #tpu.memory_space<vmem>>, %arg3: memref<1x128xf32, #tpu.memory_space<vmem>>, %arg4: memref<1x128xf32, #tpu.memory_space<vmem>>, %arg5: memref<128x32xbf16, #tpu.memory_space<vmem>>, %arg6: memref<128x32xbf16, #tpu.memory_space<vmem>>, %arg7: memref<128x32xbf16, #tpu.memory_space<vmem>>, %arg8: memref<1x4x8x8xbf16, #tpu.memory_space<vmem>>, %arg9: memref<1x4x8x8xbf16, #tpu.memory_space<vmem>>, %arg10: memref<1x4x8x8xbf16, #tpu.memory_space<vmem>>) attributes {dimension_semantics = [#tpu.dimension_semantics<parallel>, #tpu.dimension_semantics<parallel>], iteration_bounds = array<i64: 2, 1>, scalar_prefetch = 0 : i64, scratch_operands = 0 : i64, tpu.core_type = #tpu.core_type<tc>, window_params = [{transform_indices = @transform_0, window_bounds = array<i64: 1, 8, 128>}, {pipeline_mode = #tpu.pipeline_mode<synchronous>, transform_indices = @transform_1, window_bounds = array<i64: 1, 128>}, {pipeline_mode = #tpu.pipeline_mode<synchronous>, transform_indices = @transform_2, window_bounds = array<i64: 1, 128>}, {pipeline_mode = #tpu.pipeline_mode<synchronous>, transform_indices = @transform_3, window_bounds = array<i64: 128, 32>}, {pipeline_mode = #tpu.pipeline_mode<synchronous>, transform_indices = @transform_4, window_bounds = array<i64: 128, 32>}, {pipeline_mode = #tpu.pipeline_mode<synchronous>, transform_indices = @transform_5, window_bounds = array<i64: 128, 32>}, {transform_indices = @transform_6, window_bounds = array<i64: 1, 4, 8, 8>}, {transform_indices = @transform_7, window_bounds = array<i64: 1, 4, 8, 8>}, {transform_indices = @transform_8, window_bounds = array<i64: 1, 4, 8, 8>}]} {
    %c0 = arith.constant 0 : index
    %c0_0 = arith.constant 0 : index
    %c0_1 = arith.constant 0 : index
    %0 = vector.load %arg2[%c0, %c0_0, %c0_1] : memref<1x8x128xf32, #tpu.memory_space<vmem>>, vector<1x8x128xf32>
    %1 = vector.shape_cast %0 : vector<1x8x128xf32> to vector<8x128xf32>
    %c0_2 = arith.constant 0 : index
    %c0_3 = arith.constant 0 : index
    %2 = vector.load %arg3[%c0_2, %c0_3] : memref<1x128xf32, #tpu.memory_space<vmem>>, vector<1x128xf32>
    %3 = vector.shape_cast %2 : vector<1x128xf32> to vector<128xf32>
    %c0_4 = arith.constant 0 : index
    %c0_5 = arith.constant 0 : index
    %4 = vector.load %arg4[%c0_4, %c0_5] : memref<1x128xf32, #tpu.memory_space<vmem>>, vector<1x128xf32>
    %5 = vector.shape_cast %4 : vector<1x128xf32> to vector<128xf32>
    %cst = arith.constant dense<0.000000e+00> : vector<8xf32>
    %6 = vector.multi_reduction <add>, %1, %cst [1] : vector<8x128xf32> to vector<8xf32>
    %7 = vector.shape_cast %6 : vector<8xf32> to vector<8x1xf32>
    %cst_6 = arith.constant 3.125000e-02 : f32
    %8 = vector.broadcast %cst_6 : f32 to vector<8x1xf32>
    %9 = arith.mulf %7, %8 : vector<8x1xf32>
    %10 = vector.broadcast %9 : vector<8x1xf32> to vector<8x128xf32>
    %11 = arith.subf %1, %10 : vector<8x128xf32>
    %12 = arith.mulf %11, %11 : vector<8x128xf32>
    %cst_7 = arith.constant dense<0.000000e+00> : vector<8xf32>
    %13 = vector.multi_reduction <add>, %12, %cst_7 [1] : vector<8x128xf32> to vector<8xf32>
    %14 = vector.shape_cast %13 : vector<8xf32> to vector<8x1xf32>
    %15 = arith.mulf %9, %9 : vector<8x1xf32>
    %cst_8 = arith.constant 9.600000e+01 : f32
    %16 = vector.broadcast %cst_8 : f32 to vector<8x1xf32>
    %17 = arith.mulf %16, %15 : vector<8x1xf32>
    %18 = arith.subf %14, %17 : vector<8x1xf32>
    %cst_9 = arith.constant 3.125000e-02 : f32
    %19 = vector.broadcast %cst_9 : f32 to vector<8x1xf32>
    %20 = arith.mulf %18, %19 : vector<8x1xf32>
    %cst_10 = arith.constant 9.99999974E-6 : f32
    %21 = vector.broadcast %cst_10 : f32 to vector<8x1xf32>
    %22 = arith.addf %20, %21 : vector<8x1xf32>
    %23 = math.rsqrt %22 : vector<8x1xf32>
    %24 = vector.broadcast %23 : vector<8x1xf32> to vector<8x128xf32>
    %25 = arith.mulf %11, %24 : vector<8x128xf32>
    %26 = vector.shape_cast %3 : vector<128xf32> to vector<1x128xf32>
    %27 = vector.broadcast %26 : vector<1x128xf32> to vector<8x128xf32>
    %28 = arith.mulf %25, %27 : vector<8x128xf32>
    %29 = vector.shape_cast %5 : vector<128xf32> to vector<1x128xf32>
    %30 = vector.broadcast %29 : vector<1x128xf32> to vector<8x128xf32>
    %31 = arith.addf %28, %30 : vector<8x128xf32>
    %32 = arith.truncf %31 : vector<8x128xf32> to vector<8x128xbf16>
    %c0_11 = arith.constant 0 : index
    %c0_12 = arith.constant 0 : index
    %33 = vector.load %arg5[%c0_11, %c0_12] : memref<128x32xbf16, #tpu.memory_space<vmem>>, vector<128x32xbf16>
    %cst_13 = arith.constant dense<0.000000e+00> : vector<8x32xf32>
    %34 = tpu.matmul %32, %33, %cst_13 {dimension_numbers = #tpu.dot_dimension_numbers<[1], [0], [0], [1], [0, 0, 1, 1], [], []>} : vector<8x128xbf16>, vector<128x32xbf16>, vector<8x32xf32> -> vector<8x32xf32>
    %c0_14 = arith.constant 0 : index
    %c0_15 = arith.constant 0 : index
    %35 = vector.load %arg6[%c0_14, %c0_15] : memref<128x32xbf16, #tpu.memory_space<vmem>>, vector<128x32xbf16>
    %cst_16 = arith.constant dense<0.000000e+00> : vector<8x32xf32>
    %36 = tpu.matmul %32, %35, %cst_16 {dimension_numbers = #tpu.dot_dimension_numbers<[1], [0], [0], [1], [0, 0, 1, 1], [], []>} : vector<8x128xbf16>, vector<128x32xbf16>, vector<8x32xf32> -> vector<8x32xf32>
    %c0_17 = arith.constant 0 : index
    %c0_18 = arith.constant 0 : index
    %37 = vector.load %arg7[%c0_17, %c0_18] : memref<128x32xbf16, #tpu.memory_space<vmem>>, vector<128x32xbf16>
    %cst_19 = arith.constant dense<0.000000e+00> : vector<8x32xf32>
    %38 = tpu.matmul %32, %37, %cst_19 {dimension_numbers = #tpu.dot_dimension_numbers<[1], [0], [0], [1], [0, 0, 1, 1], [], []>} : vector<8x128xbf16>, vector<128x32xbf16>, vector<8x32xf32> -> vector<8x32xf32>
    %39 = arith.truncf %34 : vector<8x32xf32> to vector<8x32xbf16>
    %40 = arith.truncf %36 : vector<8x32xf32> to vector<8x32xbf16>
    %41 = arith.truncf %38 : vector<8x32xf32> to vector<8x32xbf16>
    %42 = vector.extract_strided_slice %39 {offsets = [0, 0], sizes = [8, 8], strides = [1, 1]} : vector<8x32xbf16> to vector<8x8xbf16>
    %c0_20 = arith.constant 0 : index
    %c0_21 = arith.constant 0 : index
    %c0_22 = arith.constant 0 : index
    %c0_23 = arith.constant 0 : index
    %43 = vector.load %arg8[%c0_20, %c0_21, %c0_22, %c0_23] : memref<1x4x8x8xbf16, #tpu.memory_space<vmem>>, vector<1x1x8x8xbf16>
    %44 = vector.shape_cast %43 : vector<1x1x8x8xbf16> to vector<8x8xbf16>
    %45 = vector.shape_cast %42 : vector<8x8xbf16> to vector<1x1x8x8xbf16>
    tpu.vector_store %arg8[%c0_20, %c0_21, %c0_22, %c0_23], %45 {strides = array<i32>} : memref<1x4x8x8xbf16, #tpu.memory_space<vmem>>, vector<1x1x8x8xbf16>,
    %46 = vector.extract_strided_slice %40 {offsets = [0, 0], sizes = [8, 8], strides = [1, 1]} : vector<8x32xbf16> to vector<8x8xbf16>
    %c0_24 = arith.constant 0 : index
    %c0_25 = arith.constant 0 : index
    %c0_26 = arith.constant 0 : index
    %c0_27 = arith.constant 0 : index
    %47 = vector.load %arg9[%c0_24, %c0_25, %c0_26, %c0_27] : memref<1x4x8x8xbf16, #tpu.memory_space<vmem>>, vector<1x1x8x8xbf16>
    %48 = vector.shape_cast %47 : vector<1x1x8x8xbf16> to vector<8x8xbf16>
    %49 = vector.shape_cast %46 : vector<8x8xbf16> to vector<1x1x8x8xbf16>
    tpu.vector_store %arg9[%c0_24, %c0_25, %c0_26, %c0_27], %49 {strides = array<i32>} : memref<1x4x8x8xbf16, #tpu.memory_space<vmem>>, vector<1x1x8x8xbf16>,
    %50 = vector.extract_strided_slice %41 {offsets = [0, 0], sizes = [8, 8], strides = [1, 1]} : vector<8x32xbf16> to vector<8x8xbf16>
    %c0_28 = arith.constant 0 : index
    %c0_29 = arith.constant 0 : index
    %c0_30 = arith.constant 0 : index
    %c0_31 = arith.constant 0 : index
    %51 = vector.load %arg10[%c0_28, %c0_29, %c0_30, %c0_31] : memref<1x4x8x8xbf16, #tpu.memory_space<vmem>>, vector<1x1x8x8xbf16>
    %52 = vector.shape_cast %51 : vector<1x1x8x8xbf16> to vector<8x8xbf16>
    %53 = vector.shape_cast %50 : vector<8x8xbf16> to vector<1x1x8x8xbf16>
    tpu.vector_store %arg10[%c0_28, %c0_29, %c0_30, %c0_31], %53 {strides = array<i32>} : memref<1x4x8x8xbf16, #tpu.memory_space<vmem>>, vector<1x1x8x8xbf16>,
    %54 = vector.extract_strided_slice %39 {offsets = [0, 8], sizes = [8, 8], strides = [1, 1]} : vector<8x32xbf16> to vector<8x8xbf16>
    %c0_32 = arith.constant 0 : index
    %c1 = arith.constant 1 : index
    %c0_33 = arith.constant 0 : index
    %c0_34 = arith.constant 0 : index
    %55 = vector.load %arg8[%c0_32, %c1, %c0_33, %c0_34] : memref<1x4x8x8xbf16, #tpu.memory_space<vmem>>, vector<1x1x8x8xbf16>
    %56 = vector.shape_cast %55 : vector<1x1x8x8xbf16> to vector<8x8xbf16>
    %57 = vector.shape_cast %54 : vector<8x8xbf16> to vector<1x1x8x8xbf16>
    tpu.vector_store %arg8[%c0_32, %c1, %c0_33, %c0_34], %57 {strides = array<i32>} : memref<1x4x8x8xbf16, #tpu.memory_space<vmem>>, vector<1x1x8x8xbf16>,
    %58 = vector.extract_strided_slice %40 {offsets = [0, 8], sizes = [8, 8], strides = [1, 1]} : vector<8x32xbf16> to vector<8x8xbf16>
    %c0_35 = arith.constant 0 : index
    %c1_36 = arith.constant 1 : index
    %c0_37 = arith.constant 0 : index
    %c0_38 = arith.constant 0 : index
    %59 = vector.load %arg9[%c0_35, %c1_36, %c0_37, %c0_38] : memref<1x4x8x8xbf16, #tpu.memory_space<vmem>>, vector<1x1x8x8xbf16>
    %60 = vector.shape_cast %59 : vector<1x1x8x8xbf16> to vector<8x8xbf16>
    %61 = vector.shape_cast %58 : vector<8x8xbf16> to vector<1x1x8x8xbf16>
    tpu.vector_store %arg9[%c0_35, %c1_36, %c0_37, %c0_38], %61 {strides = array<i32>} : memref<1x4x8x8xbf16, #tpu.memory_space<vmem>>, vector<1x1x8x8xbf16>,
    %62 = vector.extract_strided_slice %41 {offsets = [0, 8], sizes = [8, 8], strides = [1, 1]} : vector<8x32xbf16> to vector<8x8xbf16>
    %c0_39 = arith.constant 0 : index
    %c1_40 = arith.constant 1 : index
    %c0_41 = arith.constant 0 : index
    %c0_42 = arith.constant 0 : index
    %63 = vector.load %arg10[%c0_39, %c1_40, %c0_41, %c0_42] : memref<1x4x8x8xbf16, #tpu.memory_space<vmem>>, vector<1x1x8x8xbf16>
    %64 = vector.shape_cast %63 : vector<1x1x8x8xbf16> to vector<8x8xbf16>
    %65 = vector.shape_cast %62 : vector<8x8xbf16> to vector<1x1x8x8xbf16>
    tpu.vector_store %arg10[%c0_39, %c1_40, %c0_41, %c0_42], %65 {strides = array<i32>} : memref<1x4x8x8xbf16, #tpu.memory_space<vmem>>, vector<1x1x8x8xbf16>,
    %66 = vector.extract_strided_slice %39 {offsets = [0, 16], sizes = [8, 8], strides = [1, 1]} : vector<8x32xbf16> to vector<8x8xbf16>
    %c0_43 = arith.constant 0 : index
    %c2 = arith.constant 2 : index
    %c0_44 = arith.constant 0 : index
    %c0_45 = arith.constant 0 : index
    %67 = vector.load %arg8[%c0_43, %c2, %c0_44, %c0_45] : memref<1x4x8x8xbf16, #tpu.memory_space<vmem>>, vector<1x1x8x8xbf16>
    %68 = vector.shape_cast %67 : vector<1x1x8x8xbf16> to vector<8x8xbf16>
    %69 = vector.shape_cast %66 : vector<8x8xbf16> to vector<1x1x8x8xbf16>
    tpu.vector_store %arg8[%c0_43, %c2, %c0_44, %c0_45], %69 {strides = array<i32>} : memref<1x4x8x8xbf16, #tpu.memory_space<vmem>>, vector<1x1x8x8xbf16>,
    %70 = vector.extract_strided_slice %40 {offsets = [0, 16], sizes = [8, 8], strides = [1, 1]} : vector<8x32xbf16> to vector<8x8xbf16>
    %c0_46 = arith.constant 0 : index
    %c2_47 = arith.constant 2 : index
    %c0_48 = arith.constant 0 : index
    %c0_49 = arith.constant 0 : index
    %71 = vector.load %arg9[%c0_46, %c2_47, %c0_48, %c0_49] : memref<1x4x8x8xbf16, #tpu.memory_space<vmem>>, vector<1x1x8x8xbf16>
    %72 = vector.shape_cast %71 : vector<1x1x8x8xbf16> to vector<8x8xbf16>
    %73 = vector.shape_cast %70 : vector<8x8xbf16> to vector<1x1x8x8xbf16>
    tpu.vector_store %arg9[%c0_46, %c2_47, %c0_48, %c0_49], %73 {strides = array<i32>} : memref<1x4x8x8xbf16, #tpu.memory_space<vmem>>, vector<1x1x8x8xbf16>,
    %74 = vector.extract_strided_slice %41 {offsets = [0, 16], sizes = [8, 8], strides = [1, 1]} : vector<8x32xbf16> to vector<8x8xbf16>
    %c0_50 = arith.constant 0 : index
    %c2_51 = arith.constant 2 : index
    %c0_52 = arith.constant 0 : index
    %c0_53 = arith.constant 0 : index
    %75 = vector.load %arg10[%c0_50, %c2_51, %c0_52, %c0_53] : memref<1x4x8x8xbf16, #tpu.memory_space<vmem>>, vector<1x1x8x8xbf16>
    %76 = vector.shape_cast %75 : vector<1x1x8x8xbf16> to vector<8x8xbf16>
    %77 = vector.shape_cast %74 : vector<8x8xbf16> to vector<1x1x8x8xbf16>
    tpu.vector_store %arg10[%c0_50, %c2_51, %c0_52, %c0_53], %77 {strides = array<i32>} : memref<1x4x8x8xbf16, #tpu.memory_space<vmem>>, vector<1x1x8x8xbf16>,
    %78 = vector.extract_strided_slice %39 {offsets = [0, 24], sizes = [8, 8], strides = [1, 1]} : vector<8x32xbf16> to vector<8x8xbf16>
    %c0_54 = arith.constant 0 : index
    %c3 = arith.constant 3 : index
    %c0_55 = arith.constant 0 : index
    %c0_56 = arith.constant 0 : index
    %79 = vector.load %arg8[%c0_54, %c3, %c0_55, %c0_56] : memref<1x4x8x8xbf16, #tpu.memory_space<vmem>>, vector<1x1x8x8xbf16>
    %80 = vector.shape_cast %79 : vector<1x1x8x8xbf16> to vector<8x8xbf16>
    %81 = vector.shape_cast %78 : vector<8x8xbf16> to vector<1x1x8x8xbf16>
    tpu.vector_store %arg8[%c0_54, %c3, %c0_55, %c0_56], %81 {strides = array<i32>} : memref<1x4x8x8xbf16, #tpu.memory_space<vmem>>, vector<1x1x8x8xbf16>,
    %82 = vector.extract_strided_slice %40 {offsets = [0, 24], sizes = [8, 8], strides = [1, 1]} : vector<8x32xbf16> to vector<8x8xbf16>
    %c0_57 = arith.constant 0 : index
    %c3_58 = arith.constant 3 : index
    %c0_59 = arith.constant 0 : index
    %c0_60 = arith.constant 0 : index
    %83 = vector.load %arg9[%c0_57, %c3_58, %c0_59, %c0_60] : memref<1x4x8x8xbf16, #tpu.memory_space<vmem>>, vector<1x1x8x8xbf16>
    %84 = vector.shape_cast %83 : vector<1x1x8x8xbf16> to vector<8x8xbf16>
    %85 = vector.shape_cast %82 : vector<8x8xbf16> to vector<1x1x8x8xbf16>
    tpu.vector_store %arg9[%c0_57, %c3_58, %c0_59, %c0_60], %85 {strides = array<i32>} : memref<1x4x8x8xbf16, #tpu.memory_space<vmem>>, vector<1x1x8x8xbf16>,
    %86 = vector.extract_strided_slice %41 {offsets = [0, 24], sizes = [8, 8], strides = [1, 1]} : vector<8x32xbf16> to vector<8x8xbf16>
    %c0_61 = arith.constant 0 : index
    %c3_62 = arith.constant 3 : index
    %c0_63 = arith.constant 0 : index
    %c0_64 = arith.constant 0 : index
    %87 = vector.load %arg10[%c0_61, %c3_62, %c0_63, %c0_64] : memref<1x4x8x8xbf16, #tpu.memory_space<vmem>>, vector<1x1x8x8xbf16>
    %88 = vector.shape_cast %87 : vector<1x1x8x8xbf16> to vector<8x8xbf16>
    %89 = vector.shape_cast %86 : vector<8x8xbf16> to vector<1x1x8x8xbf16>
    tpu.vector_store %arg10[%c0_61, %c3_62, %c0_63, %c0_64], %89 {strides = array<i32>} : memref<1x4x8x8xbf16, #tpu.memory_space<vmem>>, vector<1x1x8x8xbf16>,
    return
  }
  func.func @transform_0(%arg0: i32, %arg1: i32) -> (i32, i32, i32) {
    %c0_i32 = arith.constant 0 : i32
    %c0_i32_0 = arith.constant 0 : i32
    return %arg0, %arg1, %c0_i32 : i32, i32, i32
  }
  func.func @transform_1(%arg0: i32, %arg1: i32) -> (i32, i32) {
    %c0_i32 = arith.constant 0 : i32
    %c0_i32_0 = arith.constant 0 : i32
    %c0_i32_1 = arith.constant 0 : i32
    return %c0_i32, %c0_i32_0 : i32, i32
  }
  func.func @transform_2(%arg0: i32, %arg1: i32) -> (i32, i32) {
    %c0_i32 = arith.constant 0 : i32
    %c0_i32_0 = arith.constant 0 : i32
    %c0_i32_1 = arith.constant 0 : i32
    return %c0_i32, %c0_i32_0 : i32, i32
  }
  func.func @transform_3(%arg0: i32, %arg1: i32) -> (i32, i32) {
    %c0_i32 = arith.constant 0 : i32
    %c0_i32_0 = arith.constant 0 : i32
    %c0_i32_1 = arith.constant 0 : i32
    return %c0_i32, %c0_i32_0 : i32, i32
  }
  func.func @transform_4(%arg0: i32, %arg1: i32) -> (i32, i32) {
    %c0_i32 = arith.constant 0 : i32
    %c0_i32_0 = arith.constant 0 : i32
    %c0_i32_1 = arith.constant 0 : i32
    return %c0_i32, %c0_i32_0 : i32, i32
  }
  func.func @transform_5(%arg0: i32, %arg1: i32) -> (i32, i32) {
    %c0_i32 = arith.constant 0 : i32
    %c0_i32_0 = arith.constant 0 : i32
    %c0_i32_1 = arith.constant 0 : i32
    return %c0_i32, %c0_i32_0 : i32, i32
  }
  func.func @transform_6(%arg0: i32, %arg1: i32) -> (i32, i32, i32, i32) {
    %c0_i32 = arith.constant 0 : i32
    %c0_i32_0 = arith.constant 0 : i32
    %c0_i32_1 = arith.constant 0 : i32
    return %arg0, %c0_i32, %arg1, %c0_i32_0 : i32, i32, i32, i32
  }
  func.func @transform_7(%arg0: i32, %arg1: i32) -> (i32, i32, i32, i32) {
    %c0_i32 = arith.constant 0 : i32
    %c0_i32_0 = arith.constant 0 : i32
    %c0_i32_1 = arith.constant 0 : i32
    return %arg0, %c0_i32, %arg1, %c0_i32_0 : i32, i32, i32, i32
  }
  func.func @transform_8(%arg0: i32, %arg1: i32) -> (i32, i32, i32, i32) {
    %c0_i32 = arith.constant 0 : i32
    %c0_i32_0 = arith.constant 0 : i32
    %c0_i32_1 = arith.constant 0 : i32
    return %arg0, %c0_i32, %arg1, %c0_i32_0 : i32, i32, i32, i32
  }
}

module attributes {stable_mosaic.version = 11 : i64} {
  func.func @_flash_attn_kernel(%arg0: i32, %arg1: i32, %arg2: i32, %arg3: memref<1x4x8x8xbf16, #tpu.memory_space<vmem>>, %arg4: memref<1x4x8x8xbf16, #tpu.memory_space<vmem>>, %arg5: memref<1x4x8x8xbf16, #tpu.memory_space<vmem>>, %arg6: memref<1x8x128xbf16, #tpu.memory_space<vmem>>, %arg7: memref<4x8x1xf32, #tpu.memory_space<vmem>>, %arg8: memref<4x8x1xf32, #tpu.memory_space<vmem>>, %arg9: memref<4x8x8xf32, #tpu.memory_space<vmem>>) attributes {dimension_semantics = [#tpu.dimension_semantics<parallel>, #tpu.dimension_semantics<parallel>, #tpu.dimension_semantics<arbitrary>], iteration_bounds = array<i64: 2, 1, 1>, scalar_prefetch = 0 : i64, scratch_operands = 3 : i64, tpu.core_type = #tpu.core_type<tc>, window_params = [{transform_indices = @transform_0, window_bounds = array<i64: 1, 4, 8, 8>}, {transform_indices = @transform_1, window_bounds = array<i64: 1, 4, 8, 8>}, {transform_indices = @transform_2, window_bounds = array<i64: 1, 4, 8, 8>}, {transform_indices = @transform_3, window_bounds = array<i64: 1, 8, 128>}]} {
    %c0_i32 = arith.constant 0 : i32
    %0 = arith.cmpi eq, %arg2, %c0_i32 : i32
    %1 = arith.extui %0 : i1 to i32
    %c0_i32_0 = arith.constant 0 : i32
    %2 = arith.cmpi ne, %1, %c0_i32_0 : i32
    scf.if %2 {
      %cst_35 = arith.constant 0xFF800000 : f32
      %36 = vector.broadcast %cst_35 : f32 to vector<4x8x1xf32>
      %c0_36 = arith.constant 0 : index
      %c0_37 = arith.constant 0 : index
      %c0_38 = arith.constant 0 : index
      %37 = vector.load %arg7[%c0_36, %c0_37, %c0_38] : memref<4x8x1xf32, #tpu.memory_space<vmem>>, vector<4x8x1xf32>
      tpu.vector_store %arg7[%c0_36, %c0_37, %c0_38], %36 {strides = array<i32>} : memref<4x8x1xf32, #tpu.memory_space<vmem>>, vector<4x8x1xf32>,
      %cst_39 = arith.constant 0.000000e+00 : f32
      %38 = vector.broadcast %cst_39 : f32 to vector<4x8x1xf32>
      %c0_40 = arith.constant 0 : index
      %c0_41 = arith.constant 0 : index
      %c0_42 = arith.constant 0 : index
      %39 = vector.load %arg8[%c0_40, %c0_41, %c0_42] : memref<4x8x1xf32, #tpu.memory_space<vmem>>, vector<4x8x1xf32>
      tpu.vector_store %arg8[%c0_40, %c0_41, %c0_42], %38 {strides = array<i32>} : memref<4x8x1xf32, #tpu.memory_space<vmem>>, vector<4x8x1xf32>,
      %cst_43 = arith.constant 0.000000e+00 : f32
      %40 = vector.broadcast %cst_43 : f32 to vector<4x8x8xf32>
      %c0_44 = arith.constant 0 : index
      %c0_45 = arith.constant 0 : index
      %c0_46 = arith.constant 0 : index
      %41 = vector.load %arg9[%c0_44, %c0_45, %c0_46] : memref<4x8x8xf32, #tpu.memory_space<vmem>>, vector<4x8x8xf32>
      tpu.vector_store %arg9[%c0_44, %c0_45, %c0_46], %40 {strides = array<i32>} : memref<4x8x8xf32, #tpu.memory_space<vmem>>, vector<4x8x8xf32>,
    } else {
    }
    %c0 = arith.constant 0 : index
    %c0_1 = arith.constant 0 : index
    %c0_2 = arith.constant 0 : index
    %c0_3 = arith.constant 0 : index
    %3 = vector.load %arg3[%c0, %c0_1, %c0_2, %c0_3] : memref<1x4x8x8xbf16, #tpu.memory_space<vmem>>, vector<1x4x8x8xbf16>
    %4 = vector.shape_cast %3 : vector<1x4x8x8xbf16> to vector<4x8x8xbf16>
    %c0_4 = arith.constant 0 : index
    %c0_5 = arith.constant 0 : index
    %c0_6 = arith.constant 0 : index
    %c0_7 = arith.constant 0 : index
    %5 = vector.load %arg4[%c0_4, %c0_5, %c0_6, %c0_7] : memref<1x4x8x8xbf16, #tpu.memory_space<vmem>>, vector<1x4x8x8xbf16>
    %6 = vector.shape_cast %5 : vector<1x4x8x8xbf16> to vector<4x8x8xbf16>
    %c0_8 = arith.constant 0 : index
    %c0_9 = arith.constant 0 : index
    %c0_10 = arith.constant 0 : index
    %c0_11 = arith.constant 0 : index
    %7 = vector.load %arg5[%c0_8, %c0_9, %c0_10, %c0_11] : memref<1x4x8x8xbf16, #tpu.memory_space<vmem>>, vector<1x4x8x8xbf16>
    %8 = vector.shape_cast %7 : vector<1x4x8x8xbf16> to vector<4x8x8xbf16>
    "tpu.trace_start"() <{level = 10 : i32, message = "hqd,hkd->hqk"}> : () -> ()
    %cst = arith.constant dense<0.000000e+00> : vector<4x8x8xf32>
    %9 = tpu.matmul %4, %6, %cst {dimension_numbers = #tpu.dot_dimension_numbers<[2], [2], [1], [1], [0, 0, 0, 1, 1, 1], [0], [0]>} : vector<4x8x8xbf16>, vector<4x8x8xbf16>, vector<4x8x8xf32> -> vector<4x8x8xf32>
    "tpu.trace_stop"() : () -> ()
    %c0_12 = arith.constant 0 : index
    %c0_13 = arith.constant 0 : index
    %c0_14 = arith.constant 0 : index
    %10 = vector.load %arg7[%c0_12, %c0_13, %c0_14] : memref<4x8x1xf32, #tpu.memory_space<vmem>>, vector<4x8x1xf32>
    %cst_15 = arith.constant dense<0xFF800000> : vector<4x8xf32>
    %11 = vector.multi_reduction <maximumf>, %9, %cst_15 [2] : vector<4x8x8xf32> to vector<4x8xf32>
    %12 = vector.shape_cast %11 : vector<4x8xf32> to vector<4x8x1xf32>
    %13 = arith.maximumf %10, %12 : vector<4x8x1xf32>
    %14 = arith.subf %10, %13 : vector<4x8x1xf32>
    %15 = math.exp %14 : vector<4x8x1xf32>
    %16 = vector.broadcast %13 : vector<4x8x1xf32> to vector<4x8x8xf32>
    %17 = arith.subf %9, %16 : vector<4x8x8xf32>
    %18 = math.exp %17 : vector<4x8x8xf32>
    %c0_16 = arith.constant 0 : index
    %c0_17 = arith.constant 0 : index
    %c0_18 = arith.constant 0 : index
    %19 = vector.load %arg8[%c0_16, %c0_17, %c0_18] : memref<4x8x1xf32, #tpu.memory_space<vmem>>, vector<4x8x1xf32>
    %20 = arith.mulf %15, %19 : vector<4x8x1xf32>
    %cst_19 = arith.constant dense<0.000000e+00> : vector<4x8xf32>
    %21 = vector.multi_reduction <add>, %18, %cst_19 [2] : vector<4x8x8xf32> to vector<4x8xf32>
    %22 = vector.shape_cast %21 : vector<4x8xf32> to vector<4x8x1xf32>
    %23 = arith.addf %20, %22 : vector<4x8x1xf32>
    %c0_20 = arith.constant 0 : index
    %c0_21 = arith.constant 0 : index
    %c0_22 = arith.constant 0 : index
    %24 = vector.load %arg8[%c0_20, %c0_21, %c0_22] : memref<4x8x1xf32, #tpu.memory_space<vmem>>, vector<4x8x1xf32>
    tpu.vector_store %arg8[%c0_20, %c0_21, %c0_22], %23 {strides = array<i32>} : memref<4x8x1xf32, #tpu.memory_space<vmem>>, vector<4x8x1xf32>,
    %c0_23 = arith.constant 0 : index
    %c0_24 = arith.constant 0 : index
    %c0_25 = arith.constant 0 : index
    %25 = vector.load %arg9[%c0_23, %c0_24, %c0_25] : memref<4x8x8xf32, #tpu.memory_space<vmem>>, vector<4x8x8xf32>
    %26 = vector.broadcast %15 : vector<4x8x1xf32> to vector<4x8x8xf32>
    %27 = arith.mulf %26, %25 : vector<4x8x8xf32>
    %28 = arith.truncf %18 : vector<4x8x8xf32> to vector<4x8x8xbf16>
    "tpu.trace_start"() <{level = 10 : i32, message = "hqk,hkd->hqd"}> : () -> ()
    %cst_26 = arith.constant dense<0.000000e+00> : vector<4x8x8xf32>
    %29 = tpu.matmul %28, %8, %cst_26 {dimension_numbers = #tpu.dot_dimension_numbers<[2], [1], [1], [2], [0, 0, 0, 1, 1, 2], [0], [0]>} : vector<4x8x8xbf16>, vector<4x8x8xbf16>, vector<4x8x8xf32> -> vector<4x8x8xf32>
    "tpu.trace_stop"() : () -> ()
    %30 = arith.addf %27, %29 : vector<4x8x8xf32>
    %c0_27 = arith.constant 0 : index
    %c0_28 = arith.constant 0 : index
    %c0_29 = arith.constant 0 : index
    %31 = vector.load %arg9[%c0_27, %c0_28, %c0_29] : memref<4x8x8xf32, #tpu.memory_space<vmem>>, vector<4x8x8xf32>
    tpu.vector_store %arg9[%c0_27, %c0_28, %c0_29], %30 {strides = array<i32>} : memref<4x8x8xf32, #tpu.memory_space<vmem>>, vector<4x8x8xf32>,
    %c0_30 = arith.constant 0 : index
    %c0_31 = arith.constant 0 : index
    %c0_32 = arith.constant 0 : index
    %32 = vector.load %arg7[%c0_30, %c0_31, %c0_32] : memref<4x8x1xf32, #tpu.memory_space<vmem>>, vector<4x8x1xf32>
    tpu.vector_store %arg7[%c0_30, %c0_31, %c0_32], %13 {strides = array<i32>} : memref<4x8x1xf32, #tpu.memory_space<vmem>>, vector<4x8x1xf32>,
    %c0_i32_33 = arith.constant 0 : i32
    %33 = arith.cmpi eq, %arg2, %c0_i32_33 : i32
    %34 = arith.extui %33 : i1 to i32
    %c0_i32_34 = arith.constant 0 : i32
    %35 = arith.cmpi ne, %34, %c0_i32_34 : i32
    scf.if %35 {
      %c0_35 = arith.constant 0 : index
      %c0_36 = arith.constant 0 : index
      %c0_37 = arith.constant 0 : index
      %36 = vector.load %arg9[%c0_35, %c0_36, %c0_37] : memref<4x8x8xf32, #tpu.memory_space<vmem>>, vector<4x8x8xf32>
      %c0_38 = arith.constant 0 : index
      %c0_39 = arith.constant 0 : index
      %c0_40 = arith.constant 0 : index
      %37 = vector.load %arg8[%c0_38, %c0_39, %c0_40] : memref<4x8x1xf32, #tpu.memory_space<vmem>>, vector<4x8x1xf32>
      %38 = tpu.reciprocal %37 {approx = true} : vector<4x8x1xf32> -> vector<4x8x1xf32>
      %39 = vector.broadcast %38 : vector<4x8x1xf32> to vector<4x8x8xf32>
      %40 = arith.mulf %36, %39 : vector<4x8x8xf32>
      %41 = vector.extract_strided_slice %40 {offsets = [0, 0, 0], sizes = [1, 8, 8], strides = [1, 1, 1]} : vector<4x8x8xf32> to vector<1x8x8xf32>
      %42 = vector.shape_cast %41 : vector<1x8x8xf32> to vector<8x8xf32>
      %43 = vector.extract_strided_slice %40 {offsets = [1, 0, 0], sizes = [1, 8, 8], strides = [1, 1, 1]} : vector<4x8x8xf32> to vector<1x8x8xf32>
      %44 = vector.shape_cast %43 : vector<1x8x8xf32> to vector<8x8xf32>
      %45 = vector.extract_strided_slice %40 {offsets = [2, 0, 0], sizes = [1, 8, 8], strides = [1, 1, 1]} : vector<4x8x8xf32> to vector<1x8x8xf32>
      %46 = vector.shape_cast %45 : vector<1x8x8xf32> to vector<8x8xf32>
      %47 = vector.extract_strided_slice %40 {offsets = [3, 0, 0], sizes = [1, 8, 8], strides = [1, 1, 1]} : vector<4x8x8xf32> to vector<1x8x8xf32>
      %48 = vector.shape_cast %47 : vector<1x8x8xf32> to vector<8x8xf32>
      %49 = tpu.concatenate %42, %44, %46, %48 in 1 : vector<8x8xf32>, vector<8x8xf32>, vector<8x8xf32>, vector<8x8xf32> -> vector<8x32xf32>
      %50 = arith.truncf %49 : vector<8x32xf32> to vector<8x32xbf16>
      %cst_41 = arith.constant 0.000000e+00 : bf16
      %51 = vector.broadcast %cst_41 : bf16 to vector<8x96xbf16>
      %52 = tpu.concatenate %50, %51 in 1 : vector<8x32xbf16>, vector<8x96xbf16> -> vector<8x128xbf16>
      %c0_42 = arith.constant 0 : index
      %c0_43 = arith.constant 0 : index
      %c0_44 = arith.constant 0 : index
      %53 = vector.load %arg6[%c0_42, %c0_43, %c0_44] : memref<1x8x128xbf16, #tpu.memory_space<vmem>>, vector<1x8x128xbf16>
      %54 = vector.shape_cast %53 : vector<1x8x128xbf16> to vector<8x128xbf16>
      %55 = vector.shape_cast %52 : vector<8x128xbf16> to vector<1x8x128xbf16>
      tpu.vector_store %arg6[%c0_42, %c0_43, %c0_44], %55 {strides = array<i32>} : memref<1x8x128xbf16, #tpu.memory_space<vmem>>, vector<1x8x128xbf16>,
    } else {
    }
    return
  }
  func.func @transform_0(%arg0: i32, %arg1: i32, %arg2: i32) -> (i32, i32, i32, i32) {
    %c0_i32 = arith.constant 0 : i32
    %c0_i32_0 = arith.constant 0 : i32
    %c0_i32_1 = arith.constant 0 : i32
    return %arg0, %c0_i32, %arg1, %c0_i32_0 : i32, i32, i32, i32
  }
  func.func @transform_1(%arg0: i32, %arg1: i32, %arg2: i32) -> (i32, i32, i32, i32) {
    %c0_i32 = arith.constant 0 : i32
    %c0_i32_0 = arith.constant 0 : i32
    %c0_i32_1 = arith.constant 0 : i32
    return %arg0, %c0_i32, %arg2, %c0_i32_0 : i32, i32, i32, i32
  }
  func.func @transform_2(%arg0: i32, %arg1: i32, %arg2: i32) -> (i32, i32, i32, i32) {
    %c0_i32 = arith.constant 0 : i32
    %c0_i32_0 = arith.constant 0 : i32
    %c0_i32_1 = arith.constant 0 : i32
    return %arg0, %c0_i32, %arg2, %c0_i32_0 : i32, i32, i32, i32
  }
  func.func @transform_3(%arg0: i32, %arg1: i32, %arg2: i32) -> (i32, i32, i32) {
    %c0_i32 = arith.constant 0 : i32
    %c0_i32_0 = arith.constant 0 : i32
    return %arg0, %arg1, %c0_i32 : i32, i32, i32
  }
}

module attributes {stable_mosaic.version = 11 : i64} {
  func.func @_proj_mlp_kernel(%arg0: i32, %arg1: i32, %arg2: memref<1x8x128xf32, #tpu.memory_space<vmem>>, %arg3: memref<1x8x128xbf16, #tpu.memory_space<vmem>>, %arg4: memref<128x128xbf16, #tpu.memory_space<vmem>>, %arg5: memref<1x128xf32, #tpu.memory_space<vmem>>, %arg6: memref<1x128xf32, #tpu.memory_space<vmem>>, %arg7: memref<1x128xf32, #tpu.memory_space<vmem>>, %arg8: memref<128x128xbf16, #tpu.memory_space<vmem>>, %arg9: memref<1x128xf32, #tpu.memory_space<vmem>>, %arg10: memref<128x128xbf16, #tpu.memory_space<vmem>>, %arg11: memref<1x128xf32, #tpu.memory_space<vmem>>, %arg12: memref<1x8x128xf32, #tpu.memory_space<vmem>>) attributes {dimension_semantics = [#tpu.dimension_semantics<parallel>, #tpu.dimension_semantics<parallel>], iteration_bounds = array<i64: 2, 1>, scalar_prefetch = 0 : i64, scratch_operands = 0 : i64, tpu.core_type = #tpu.core_type<tc>, window_params = [{transform_indices = @transform_0, window_bounds = array<i64: 1, 8, 128>}, {transform_indices = @transform_1, window_bounds = array<i64: 1, 8, 128>}, {pipeline_mode = #tpu.pipeline_mode<synchronous>, transform_indices = @transform_2, window_bounds = array<i64: 128, 128>}, {pipeline_mode = #tpu.pipeline_mode<synchronous>, transform_indices = @transform_3, window_bounds = array<i64: 1, 128>}, {pipeline_mode = #tpu.pipeline_mode<synchronous>, transform_indices = @transform_4, window_bounds = array<i64: 1, 128>}, {pipeline_mode = #tpu.pipeline_mode<synchronous>, transform_indices = @transform_5, window_bounds = array<i64: 1, 128>}, {pipeline_mode = #tpu.pipeline_mode<synchronous>, transform_indices = @transform_6, window_bounds = array<i64: 128, 128>}, {pipeline_mode = #tpu.pipeline_mode<synchronous>, transform_indices = @transform_7, window_bounds = array<i64: 1, 128>}, {pipeline_mode = #tpu.pipeline_mode<synchronous>, transform_indices = @transform_8, window_bounds = array<i64: 128, 128>}, {pipeline_mode = #tpu.pipeline_mode<synchronous>, transform_indices = @transform_9, window_bounds = array<i64: 1, 128>}, {transform_indices = @transform_10, window_bounds = array<i64: 1, 8, 128>}]} {
    %c0 = arith.constant 0 : index
    %c0_0 = arith.constant 0 : index
    %c0_1 = arith.constant 0 : index
    %0 = vector.load %arg2[%c0, %c0_0, %c0_1] : memref<1x8x128xf32, #tpu.memory_space<vmem>>, vector<1x8x128xf32>
    %1 = vector.shape_cast %0 : vector<1x8x128xf32> to vector<8x128xf32>
    %c0_2 = arith.constant 0 : index
    %c0_3 = arith.constant 0 : index
    %c0_4 = arith.constant 0 : index
    %2 = vector.load %arg3[%c0_2, %c0_3, %c0_4] : memref<1x8x128xbf16, #tpu.memory_space<vmem>>, vector<1x8x128xbf16>
    %3 = vector.shape_cast %2 : vector<1x8x128xbf16> to vector<8x128xbf16>
    %c0_5 = arith.constant 0 : index
    %c0_6 = arith.constant 0 : index
    %4 = vector.load %arg4[%c0_5, %c0_6] : memref<128x128xbf16, #tpu.memory_space<vmem>>, vector<128x128xbf16>
    %cst = arith.constant dense<0.000000e+00> : vector<8x128xf32>
    %5 = tpu.matmul %3, %4, %cst {dimension_numbers = #tpu.dot_dimension_numbers<[1], [0], [0], [1], [0, 0, 1, 1], [], []>} : vector<8x128xbf16>, vector<128x128xbf16>, vector<8x128xf32> -> vector<8x128xf32>
    %c0_7 = arith.constant 0 : index
    %c0_8 = arith.constant 0 : index
    %6 = vector.load %arg5[%c0_7, %c0_8] : memref<1x128xf32, #tpu.memory_space<vmem>>, vector<1x128xf32>
    %7 = vector.shape_cast %6 : vector<1x128xf32> to vector<128xf32>
    %8 = vector.shape_cast %7 : vector<128xf32> to vector<1x128xf32>
    %9 = vector.broadcast %8 : vector<1x128xf32> to vector<8x128xf32>
    %10 = arith.addf %5, %9 : vector<8x128xf32>
    %11 = arith.addf %1, %10 : vector<8x128xf32>
    %c0_9 = arith.constant 0 : index
    %c0_10 = arith.constant 0 : index
    %12 = vector.load %arg6[%c0_9, %c0_10] : memref<1x128xf32, #tpu.memory_space<vmem>>, vector<1x128xf32>
    %13 = vector.shape_cast %12 : vector<1x128xf32> to vector<128xf32>
    %c0_11 = arith.constant 0 : index
    %c0_12 = arith.constant 0 : index
    %14 = vector.load %arg7[%c0_11, %c0_12] : memref<1x128xf32, #tpu.memory_space<vmem>>, vector<1x128xf32>
    %15 = vector.shape_cast %14 : vector<1x128xf32> to vector<128xf32>
    %cst_13 = arith.constant dense<0.000000e+00> : vector<8xf32>
    %16 = vector.multi_reduction <add>, %11, %cst_13 [1] : vector<8x128xf32> to vector<8xf32>
    %17 = vector.shape_cast %16 : vector<8xf32> to vector<8x1xf32>
    %cst_14 = arith.constant 3.125000e-02 : f32
    %18 = vector.broadcast %cst_14 : f32 to vector<8x1xf32>
    %19 = arith.mulf %17, %18 : vector<8x1xf32>
    %20 = vector.broadcast %19 : vector<8x1xf32> to vector<8x128xf32>
    %21 = arith.subf %11, %20 : vector<8x128xf32>
    %22 = arith.mulf %21, %21 : vector<8x128xf32>
    %cst_15 = arith.constant dense<0.000000e+00> : vector<8xf32>
    %23 = vector.multi_reduction <add>, %22, %cst_15 [1] : vector<8x128xf32> to vector<8xf32>
    %24 = vector.shape_cast %23 : vector<8xf32> to vector<8x1xf32>
    %25 = arith.mulf %19, %19 : vector<8x1xf32>
    %cst_16 = arith.constant 9.600000e+01 : f32
    %26 = vector.broadcast %cst_16 : f32 to vector<8x1xf32>
    %27 = arith.mulf %26, %25 : vector<8x1xf32>
    %28 = arith.subf %24, %27 : vector<8x1xf32>
    %cst_17 = arith.constant 3.125000e-02 : f32
    %29 = vector.broadcast %cst_17 : f32 to vector<8x1xf32>
    %30 = arith.mulf %28, %29 : vector<8x1xf32>
    %cst_18 = arith.constant 9.99999974E-6 : f32
    %31 = vector.broadcast %cst_18 : f32 to vector<8x1xf32>
    %32 = arith.addf %30, %31 : vector<8x1xf32>
    %33 = math.rsqrt %32 : vector<8x1xf32>
    %34 = vector.broadcast %33 : vector<8x1xf32> to vector<8x128xf32>
    %35 = arith.mulf %21, %34 : vector<8x128xf32>
    %36 = vector.shape_cast %13 : vector<128xf32> to vector<1x128xf32>
    %37 = vector.broadcast %36 : vector<1x128xf32> to vector<8x128xf32>
    %38 = arith.mulf %35, %37 : vector<8x128xf32>
    %39 = vector.shape_cast %15 : vector<128xf32> to vector<1x128xf32>
    %40 = vector.broadcast %39 : vector<1x128xf32> to vector<8x128xf32>
    %41 = arith.addf %38, %40 : vector<8x128xf32>
    %42 = arith.truncf %41 : vector<8x128xf32> to vector<8x128xbf16>
    %c0_19 = arith.constant 0 : index
    %c0_20 = arith.constant 0 : index
    %43 = vector.load %arg8[%c0_19, %c0_20] : memref<128x128xbf16, #tpu.memory_space<vmem>>, vector<128x128xbf16>
    %cst_21 = arith.constant dense<0.000000e+00> : vector<8x128xf32>
    %44 = tpu.matmul %42, %43, %cst_21 {dimension_numbers = #tpu.dot_dimension_numbers<[1], [0], [0], [1], [0, 0, 1, 1], [], []>} : vector<8x128xbf16>, vector<128x128xbf16>, vector<8x128xf32> -> vector<8x128xf32>
    %c0_22 = arith.constant 0 : index
    %c0_23 = arith.constant 0 : index
    %45 = vector.load %arg9[%c0_22, %c0_23] : memref<1x128xf32, #tpu.memory_space<vmem>>, vector<1x128xf32>
    %46 = vector.shape_cast %45 : vector<1x128xf32> to vector<128xf32>
    %47 = vector.shape_cast %46 : vector<128xf32> to vector<1x128xf32>
    %48 = vector.broadcast %47 : vector<1x128xf32> to vector<8x128xf32>
    %49 = arith.addf %44, %48 : vector<8x128xf32>
    %cst_24 = arith.constant 0.000000e+00 : f32
    %50 = vector.broadcast %cst_24 : f32 to vector<8x128xf32>
    %51 = arith.maximumf %49, %50 : vector<8x128xf32>
    %52 = arith.truncf %51 : vector<8x128xf32> to vector<8x128xbf16>
    %c0_25 = arith.constant 0 : index
    %c0_26 = arith.constant 0 : index
    %53 = vector.load %arg10[%c0_25, %c0_26] : memref<128x128xbf16, #tpu.memory_space<vmem>>, vector<128x128xbf16>
    %cst_27 = arith.constant dense<0.000000e+00> : vector<8x128xf32>
    %54 = tpu.matmul %52, %53, %cst_27 {dimension_numbers = #tpu.dot_dimension_numbers<[1], [0], [0], [1], [0, 0, 1, 1], [], []>} : vector<8x128xbf16>, vector<128x128xbf16>, vector<8x128xf32> -> vector<8x128xf32>
    %c0_28 = arith.constant 0 : index
    %c0_29 = arith.constant 0 : index
    %55 = vector.load %arg11[%c0_28, %c0_29] : memref<1x128xf32, #tpu.memory_space<vmem>>, vector<1x128xf32>
    %56 = vector.shape_cast %55 : vector<1x128xf32> to vector<128xf32>
    %57 = vector.shape_cast %56 : vector<128xf32> to vector<1x128xf32>
    %58 = vector.broadcast %57 : vector<1x128xf32> to vector<8x128xf32>
    %59 = arith.addf %54, %58 : vector<8x128xf32>
    %60 = arith.addf %11, %59 : vector<8x128xf32>
    %c0_30 = arith.constant 0 : index
    %c0_31 = arith.constant 0 : index
    %c0_32 = arith.constant 0 : index
    %61 = vector.load %arg12[%c0_30, %c0_31, %c0_32] : memref<1x8x128xf32, #tpu.memory_space<vmem>>, vector<1x8x128xf32>
    %62 = vector.shape_cast %61 : vector<1x8x128xf32> to vector<8x128xf32>
    %63 = vector.shape_cast %60 : vector<8x128xf32> to vector<1x8x128xf32>
    tpu.vector_store %arg12[%c0_30, %c0_31, %c0_32], %63 {strides = array<i32>} : memref<1x8x128xf32, #tpu.memory_space<vmem>>, vector<1x8x128xf32>,
    return
  }
  func.func @transform_0(%arg0: i32, %arg1: i32) -> (i32, i32, i32) {
    %c0_i32 = arith.constant 0 : i32
    %c0_i32_0 = arith.constant 0 : i32
    return %arg0, %arg1, %c0_i32 : i32, i32, i32
  }
  func.func @transform_1(%arg0: i32, %arg1: i32) -> (i32, i32, i32) {
    %c0_i32 = arith.constant 0 : i32
    %c0_i32_0 = arith.constant 0 : i32
    return %arg0, %arg1, %c0_i32 : i32, i32, i32
  }
  func.func @transform_2(%arg0: i32, %arg1: i32) -> (i32, i32) {
    %c0_i32 = arith.constant 0 : i32
    %c0_i32_0 = arith.constant 0 : i32
    %c0_i32_1 = arith.constant 0 : i32
    return %c0_i32, %c0_i32_0 : i32, i32
  }
  func.func @transform_3(%arg0: i32, %arg1: i32) -> (i32, i32) {
    %c0_i32 = arith.constant 0 : i32
    %c0_i32_0 = arith.constant 0 : i32
    %c0_i32_1 = arith.constant 0 : i32
    return %c0_i32, %c0_i32_0 : i32, i32
  }
  func.func @transform_4(%arg0: i32, %arg1: i32) -> (i32, i32) {
    %c0_i32 = arith.constant 0 : i32
    %c0_i32_0 = arith.constant 0 : i32
    %c0_i32_1 = arith.constant 0 : i32
    return %c0_i32, %c0_i32_0 : i32, i32
  }
  func.func @transform_5(%arg0: i32, %arg1: i32) -> (i32, i32) {
    %c0_i32 = arith.constant 0 : i32
    %c0_i32_0 = arith.constant 0 : i32
    %c0_i32_1 = arith.constant 0 : i32
    return %c0_i32, %c0_i32_0 : i32, i32
  }
  func.func @transform_6(%arg0: i32, %arg1: i32) -> (i32, i32) {
    %c0_i32 = arith.constant 0 : i32
    %c0_i32_0 = arith.constant 0 : i32
    %c0_i32_1 = arith.constant 0 : i32
    return %c0_i32, %c0_i32_0 : i32, i32
  }
  func.func @transform_7(%arg0: i32, %arg1: i32) -> (i32, i32) {
    %c0_i32 = arith.constant 0 : i32
    %c0_i32_0 = arith.constant 0 : i32
    %c0_i32_1 = arith.constant 0 : i32
    return %c0_i32, %c0_i32_0 : i32, i32
  }
  func.func @transform_8(%arg0: i32, %arg1: i32) -> (i32, i32) {
    %c0_i32 = arith.constant 0 : i32
    %c0_i32_0 = arith.constant 0 : i32
    %c0_i32_1 = arith.constant 0 : i32
    return %c0_i32, %c0_i32_0 : i32, i32
  }
  func.func @transform_9(%arg0: i32, %arg1: i32) -> (i32, i32) {
    %c0_i32 = arith.constant 0 : i32
    %c0_i32_0 = arith.constant 0 : i32
    %c0_i32_1 = arith.constant 0 : i32
    return %c0_i32, %c0_i32_0 : i32, i32
  }
  func.func @transform_10(%arg0: i32, %arg1: i32) -> (i32, i32, i32) {
    %c0_i32 = arith.constant 0 : i32
    %c0_i32_0 = arith.constant 0 : i32
    return %arg0, %arg1, %c0_i32 : i32, i32, i32
  }
}

</mosaic_0001>

<bundles_post_ra>
// kernel: _forward.4
= control target key start
LH: loop header
LB: loop body
LE: loop exit
PB: predicated region body
PF: predicated region fallthrough
CT: control target
= control target key end

     0   :  { %s1183_s12 = smov 0   ;;  %s1185_s13 = smov 0   ;;  %s1356_s0 = inlined_call_operand.vmem [shape: bf16[2,4,8,8], index: 0, kind: input, shape index: {}]   ;;  %s1357_s1 = inlined_call_operand.vmem [shape: bf16[2,4,8,8], index: 1, kind: input, shape index: {}]   ;;  %s1358_s2 = inlined_call_operand.vmem [shape: bf16[2,4,8,8], index: 2, kind: input, shape index: {}]   ;;  %s1359_s3 = inlined_call_operand.vmem [shape: bf16[2,8,128], index: 3, kind: output, shape index: {}]  }
   0x1   :  { %s1187_s14 = smov 0  }
   0x2 LB: > { %s32_s15 = sadd.s32 1, %s1150_s13  ;;  %p990_p0 = scmp.ge.s32.totalorder %s1154_s14, 1  ;;  %s1154_s14 = sphi %s1187_s14, %s13_s14   ;;  %s1150_s13 = sphi %s1185_s13, %s1361_s13   ;;  %s1146_s12 = sphi %s1183_s12, %s1360_s12  }
   0x3   : > { %p34_p1 = scmp.ge.s32.totalorder %s32_s15, 2  ;;  %p193_p2 = scmp.lt.s32.totalorder %s1154_s14, 3 }
   0x5   : > { %s1363_s15 = smov (%p34_p1, %s32_s15), 0  ;;  %p194_p3 = pnand %p990_p0, %p193_p2 }
   0x6   : > { %p238_p4 = scmp.lt.s32.totalorder (!%p194_p3), %s1146_s12, 1  ;;  %s1160_s26 = smov (!%p194_p3), 8  }
   0x7   : > { %197 = sbr.rel (%p194_p3) target bundleno = 921 (0x399), region = 32  ;;  %s1161_s27 = smov (!%p194_p3), 16  }
   0x8   : > { %s1162_s28 = smov (!%p194_p3), 24  }
   0xc   : > { %vm283_vm0 = vcmask 64512   ;;  %v1156_v0 = vmov 0.0   ;;  %s1365_s12 = smov (!%p238_p4, %s1146_s12), 1  ;;  %vm1157_vm1 = vmmov 0   ;;  %vm274_vm2 = vcmask 7168  }
   0xd   : > { %1027 = vmatprep.subr.bf16.mxu0 %v1156_v0  ;;  %1033 = vmatprep.subr.bf16.mxu1 %v1156_v0  ;;  %284 = vst.msk [vmem:[#allocation4] sm:$0xff] %vm283_vm0, %v1156_v0  ;;  %285 = vst.msk [vmem:[#allocation4 + $0x8] sm:$0xff] %vm283_vm0, %v1156_v0  ;;  %s1218_s16 = sshll.u32 %s1365_s12, 4  ;;  %v1158_v13 = vmov -inf   ;;  %v1159_v32 = vmov 0   ;;  %vm613_vm3 = vcmask 1043456  }
   0xe   : > { %286 = vst.msk [vmem:[#allocation4 + $0x10] sm:$0xff] %vm283_vm0, %v1156_v0  ;;  %287 = vst.msk [vmem:[#allocation4 + $0x18] sm:$0xff] %vm283_vm0, %v1156_v0  ;;  %1029 = vmatprep.mubr.msk.bf16.mxu0 %vm1157_vm1, %v1156_v0  ;;  %1035 = vmatprep.mubr.msk.bf16.mxu1 %vm1157_vm1, %v1156_v0  ;;  %s253_s19 = scalar_lea.vmem %s1357_s1, %s1218_s16  ;;  %s245_s22 = scalar_lea.vmem %s1356_s0, %s1218_s16  ;;  %vm859_vm4 = vcmask 130048   ;;  %vm861_vm5 = vcmask 195584   ;;  %vm864_vm6 = vcmask 261120  }
   0xf   : > { %v292_v1 = vld [vmem:[%s253_s19] sm:$0xf]  ;;  %v293_v2 = vld [vmem:[%s253_s19 + $0x4] sm:$0xf]  ;;  %v294_v5 = vld [vmem:[%s253_s19 + $0x8] sm:$0xf]  ;;  %1106 = vset.pattern.permute.xlu0 %v1159_v32  ;;  %1107 = vset.pattern.permute.xlu1 %v1159_v32  ;;  %s261_s25 = scalar_lea.vmem %s1358_s2, %s1218_s16 }
  0x10   : > { %v305_v3 = vsel %vm283_vm0, %v292_v1, 0  ;;  %v351_v4 = vsel %vm283_vm0, %v293_v2, 0  ;;  %v295_v6 = vld [vmem:[%s253_s19 + $0xc] sm:$0xf]  ;;  %v288_v7 = vld [vmem:[%s245_s22] sm:$0xf] }
  0x11   : > { %1028 = vmatpush3.bf16.xpose.msra.mxu0 %v305_v3  ;;  %1034 = vmatpush3.bf16.xpose.msra.mxu1 %v351_v4  ;;  %v289_v8 = vld [vmem:[%s245_s22 + $0x4] sm:$0xf]  ;;  %v397_v9 = vsel %vm283_vm0, %v294_v5, 0  ;;  %v443_v10 = vsel %vm283_vm0, %v295_v6, 0  ;;  %v290_v11 = vld [vmem:[%s245_s22 + $0x8] sm:$0xf] }
  0x12   : > { %1039 = vmatprep.subr.bf16.mxu0 %v1156_v0  ;;  %1045 = vmatprep.subr.bf16.mxu1 %v1156_v0  ;;  %v291_v12 = vld [vmem:[%s245_s22 + $0xc] sm:$0xf]  ;;  %275 = vst.msk [vmem:[#allocation2] sm:$0xff] %vm274_vm2, %v1158_v13  ;;  %276 = vst.msk [vmem:[#allocation2 + $0x8] sm:$0xff] %vm274_vm2, %v1158_v13  ;;  %v296_v50 = vld [vmem:[%s261_s25] sm:$0xf] }
  0x13   : > { %277 = vst.msk [vmem:[#allocation2 + $0x10] sm:$0xff] %vm274_vm2, %v1158_v13  ;;  %278 = vst.msk [vmem:[#allocation2 + $0x18] sm:$0xff] %vm274_vm2, %v1158_v13  ;;  %v615_v52 = vsel %vm613_vm3, %v296_v50, 0  ;;  %v297_v53 = vld [vmem:[%s261_s25 + $0x4] sm:$0xf]  ;;  %s997_s29 = sshll.u32 %s1365_s12, 2 }
  0x14   : > { %279 = vst.msk [vmem:[#allocation3] sm:$0xff] %vm274_vm2, %v1156_v0  ;;  %280 = vst.msk [vmem:[#allocation3 + $0x8] sm:$0xff] %vm274_vm2, %v1156_v0  ;;  %v661_v54 = vsel %vm613_vm3, %v297_v53, 0  ;;  %v298_v55 = vld [vmem:[%s261_s25 + $0x8] sm:$0xf]  ;;  %s268_s5 = scalar_lea.vmem %s1359_s3, %s997_s29 }
  0x15   : > { %281 = vst.msk [vmem:[#allocation3 + $0x10] sm:$0xff] %vm274_vm2, %v1156_v0  ;;  %282 = vst.msk [vmem:[#allocation3 + $0x18] sm:$0xff] %vm274_vm2, %v1156_v0  ;;  %v707_v56 = vsel %vm613_vm3, %v298_v55, 0  ;;  %v299_v57 = vld [vmem:[%s261_s25 + $0xc] sm:$0xf] }
  0x16   : > { %v753_v58 = vsel %vm613_vm3, %v299_v57, 0  ;;  %v580_v57 = vld [vmem:[#allocation4 + $0x10] sm:$0xff] }
  0x18   : > { %1030 = vmatmul.mubr.msk.bf16.vlgmr.msra.gmra.mxu0 %vm283_vm0, %v288_v7  ;;  %1036 = vmatmul.mubr.msk.bf16.vlgmr.msra.gmra.mxu1 %vm283_vm0, %v289_v8 }
  0x19   : > { %1040 = vmatpush3.bf16.xpose.msra.mxu0 %v397_v9  ;;  %1046 = vmatpush3.bf16.xpose.msra.mxu1 %v443_v10  ;;  %v1276_v35 = vld [vmem:[#allocation2] sm:$0xff]  ;;  %v1281_v38 = vld [vmem:[#allocation2 + $0x8] sm:$0xff] }
  0x1a   : > { %1041 = vmatprep.mubr.msk.bf16.mxu0 %vm1157_vm1, %v1156_v0  ;;  %1047 = vmatprep.mubr.msk.bf16.mxu1 %vm1157_vm1, %v1156_v0  ;;  %v1291_v42 = vld [vmem:[#allocation2 + $0x10] sm:$0xff]  ;;  %v1299_v46 = vld [vmem:[#allocation2 + $0x18] sm:$0xff] }
  0x1b   : > { %1051 = vmatprep.subr.bf16.mxu0 %v1156_v0  ;;  %1057 = vmatprep.subr.bf16.mxu1 %v1156_v0 }
  0x20   : > { %1042 = vmatmul.mubr.msk.bf16.vlgmr.msra.gmra.mxu0 %vm283_vm0, %v290_v11  ;;  %1048 = vmatmul.mubr.msk.bf16.vlgmr.msra.gmra.mxu1 %vm283_vm0, %v291_v12 }
  0x21   : > { %1053 = vmatprep.mubr.msk.bf16.mxu0 %vm1157_vm1, %v1156_v0  ;;  %1059 = vmatprep.mubr.msk.bf16.mxu1 %vm1157_vm1, %v1156_v0 }
  0x22   : > { %1052 = vmatpush3.bf16.msra.mxu0 %v615_v52  ;;  %1058 = vmatpush3.bf16.msra.mxu1 %v661_v54 }
  0x23   : > { %1063 = vmatprep.subr.bf16.mxu0 %v1156_v0  ;;  %1069 = vmatprep.subr.bf16.mxu1 %v1156_v0 }
  0xd8   : > { %v1260_v14 = vpop.f32.mrf.mxu0  ;;  %v1262_v15 = vpop.f32.mrf.mxu1 }
  0xd9   : > { %v489_v16 = vsel %vm283_vm0, %v1260_v14, -inf  ;;  %v492_v19 = vsel %vm283_vm0, %v1262_v15, -inf }
  0xda   : > { %v1037_v17 = vpop.f32.mrf.mxu1  ;;  %490 = vmax.xlane.f32.xlu0 %v489_v16  ;;  %v1031_v18 = vpop.f32.mrf.mxu0 }
  0xdc   : > { %v344_v20 = vpop.f32.mrf.mxu0  ;;  %v390_v21 = vpop.f32.mrf.mxu1 }
  0xde   : > { %v1038_v22 = vpop.f32.mrf.mxu1  ;;  %493 = vmax.xlane.f32.xlu0 %v492_v19  ;;  %v1032_v23 = vpop.f32.mrf.mxu0 }
  0xe0   : > { %v1268_v24 = vpop.f32.mrf.mxu0  ;;  %v1270_v25 = vpop.f32.mrf.mxu1 }
  0xe1   : > { %v495_v26 = vsel %vm283_vm0, %v1268_v24, -inf  ;;  %v498_v29 = vsel %vm283_vm0, %v1270_v25, -inf }
  0xe2   : > { %v1049_v27 = vpop.f32.mrf.mxu1  ;;  %496 = vmax.xlane.f32.xlu1 %v495_v26  ;;  %v1043_v28 = vpop.f32.mrf.mxu0  ;;  %v550_v26 = vld [vmem:[#allocation3 + $0x8] sm:$0xff] }
  0xe4   : > { %v436_v30 = vpop.f32.mrf.mxu0  ;;  %v482_v31 = vpop.f32.mrf.mxu1 }
  0xe6   : > { %v1050_v33 = vpop.f32.mrf.mxu1  ;;  %499 = vmax.xlane.f32.xlu1 %v498_v29  ;;  %v1044_v34 = vpop.f32.mrf.mxu0  ;;  %v551_v29 = vld [vmem:[#allocation3 + $0x10] sm:$0xff] }
  0xe7   : > { %v552_v33 = vld [vmem:[#allocation3 + $0x18] sm:$0xff] }
 0x163   : > { %v491_v36 = vpop.xlane.xlu0 %490 }
 0x164   : > { %v1279_v37 = vmax.f32 %v1276_v35, %v491_v36 }
 0x166   : > { %v505_v39 = vsub.f32 %v1276_v35, %v1279_v37  ;;  %803 = vst.msk [vmem:[#allocation2] sm:$0xff] %vm274_vm2, %v1279_v37  ;;  %519 = vperm.xlu0 %1106, %v1279_v37  }
 0x167   : > { %v494_v40 = vpop.xlane.xlu0 %493 }
 0x168   : > { %v1289_v41 = vmax.f32 %v1281_v38, %v494_v40 }
 0x16a   : > { %v506_v43 = vsub.f32 %v1281_v38, %v1289_v41  ;;  %804 = vst.msk [vmem:[#allocation2 + $0x8] sm:$0xff] %vm274_vm2, %v1289_v41  ;;  %524 = vperm.xlu1 %1107, %v1289_v41   ;;  %v549_v41 = vld [vmem:[#allocation3] sm:$0xff] }
 0x16b   : > { %v497_v44 = vpop.xlane.xlu1 %496 }
 0x16c   : > { %v503_v45 = vmax.f32 %v1291_v42, %v497_v44  ;;  %v511_v20 = vmul.f32 1.442695, %v506_v43 }
 0x16e   : > { %v507_v47 = vsub.f32 %v1291_v42, %v503_v45  ;;  %805 = vst.msk [vmem:[#allocation2 + $0x10] sm:$0xff] %vm274_vm2, %v503_v45  ;;  %529 = vperm.xlu1 %1107, %v503_v45  }
 0x16f   : > { %v500_v48 = vpop.xlane.xlu1 %499 }
 0x170   : > { %v504_v49 = vmax.f32 %v1299_v46, %v500_v48  ;;  %v513_v19 = vmul.f32 1.442695, %v507_v47 }
 0x172   : > { %v508_v51 = vsub.f32 %v1299_v46, %v504_v49  ;;  %806 = vst.msk [vmem:[#allocation2 + $0x18] sm:$0xff] %vm274_vm2, %v504_v49  ;;  %534 = vperm.xlu1 %1107, %v504_v49  }
 0x174   : > { %v515_v21 = vmul.f32 1.442695, %v508_v51  ;;  %v579_v51 = vld [vmem:[#allocation4 + $0x8] sm:$0xff] }
 0x1e1   : > { %v520_v59 = vpop.permute.xlu0 %519 }
 0x1e2   : > { %v537_v60 = vsub.f32 %v1260_v14, %v520_v59 }
 0x1e4   : > { %v541_v61 = vmul.f32 1.442695, %v537_v60 }
 0x1e5   : > { %v525_v62 = vpop.permute.xlu1 %524 }
 0x1e6   : > { %1108 = vpow2.f32 %v541_v61  ;;  %v538_v63 = vsub.f32 %v1262_v15, %v525_v62 }
 0x1e8   : > { %v543_v1 = vmul.f32 1.442695, %v538_v63 }
 0x1e9   : > { %v530_v2 = vpop.permute.xlu1 %529 }
 0x1ea   : > { %1110 = vpow2.f32 %v543_v1  ;;  %v539_v3 = vsub.f32 %v1268_v24, %v530_v2  ;;  %v581_v2 = vld [vmem:[#allocation4 + $0x18] sm:$0xff] }
 0x1ec   : > { %v545_v4 = vmul.f32 1.442695, %v539_v3 }
 0x1ed   : > { %v535_v5 = vpop.permute.xlu1 %534 }
 0x1ee   : > { %1112 = vpow2.f32 %v545_v4  ;;  %v540_v6 = vsub.f32 %v1270_v25, %v535_v5  ;;  %v509_v25 = vmul.f32 1.442695, %v505_v39 }
 0x1f0   : > { %v547_v7 = vmul.f32 1.442695, %v540_v6 }
 0x1f2   : > { %1114 = vpow2.f32 %v547_v7 }
 0x1f3   : > { %v1109_v8 = vpop.eup %1108  ;;  %1116 = vpow2.f32 %v513_v19 }
 0x1f4   : > { %v606_v9 = vpack.c.bf16 %v1109_v8, %v1109_v8  ;;  %1118 = vpow2.f32 %v511_v20 }
 0x1f5   : > { %1120 = vpow2.f32 %v515_v21  ;;  %v578_v21 = vld [vmem:[#allocation4] sm:$0xff] }
 0x1f6   : > { %1054 = vmatmul.mubr.msk.bf16.vlgmr.msra.gmra.mxu0 %vm283_vm0, %v606_v9  ;;  %1122 = vpow2.f32 %v509_v25 }
 0x1f7   : > { %v1111_v10 = vpop.eup %1110  ;;  %1064 = vmatpush3.bf16.msra.mxu0 %v707_v56  ;;  %1065 = vmatprep.mubr.msk.bf16.mxu0 %vm1157_vm1, %v1156_v0 }
 0x1f8   : > { %v560_v11 = vsel %vm283_vm0, %v1111_v10, 0.0  ;;  %v607_v12 = vpack.c.bf16 %v1111_v10, %v1111_v10 }
 0x1f9   : > { %561 = vadd.xlane.f32.xlu1 %v560_v11 }
 0x1fa   : > { %1060 = vmatmul.mubr.msk.bf16.vlgmr.msra.gmra.mxu1 %vm283_vm0, %v607_v12 }
 0x1fb   : > { %v1113_v13 = vpop.eup %1112  ;;  %1070 = vmatpush3.bf16.msra.mxu1 %v753_v58  ;;  %1071 = vmatprep.mubr.msk.bf16.mxu1 %vm1157_vm1, %v1156_v0  ;;  %v557_v0 = vsel %vm283_vm0, %v1109_v8, 0.0 }
 0x1fc   : > { %v563_v14 = vsel %vm283_vm0, %v1113_v13, 0.0  ;;  %v608_v15 = vpack.c.bf16 %v1113_v13, %v1113_v13 }
 0x1fd   : > { %564 = vadd.xlane.f32.xlu0 %v563_v14 }
 0x1fe   : > { %1066 = vmatmul.mubr.msk.bf16.vlgmr.msra.gmra.mxu0 %vm283_vm0, %v608_v15 }
 0x1ff   : > { %v1115_v16 = vpop.eup %1114 }
 0x200   : > { %v566_v17 = vsel %vm283_vm0, %v1115_v16, 0.0  ;;  %v609_v18 = vpack.c.bf16 %v1115_v16, %v1115_v16  ;;  %v1117_v22 = vpop.eup %1116 }
 0x201   : > { %567 = vadd.xlane.f32.xlu1 %v566_v17  ;;  %v1119_v23 = vpop.eup %1118  ;;  %v555_v31 = vmul.f32 %v1117_v22, %v551_v29 }
 0x202   : > { %1072 = vmatmul.mubr.msk.bf16.vlgmr.msra.gmra.mxu1 %vm283_vm0, %v609_v18  ;;  %v1121_v24 = vpop.eup %1120  ;;  %v554_v27 = vmul.f32 %v1119_v23, %v550_v26 }
 0x203   : > { %v556_v36 = vmul.f32 %v1121_v24, %v552_v33  ;;  %v1123_v38 = vpop.eup %1122 }
 0x204   : > { %v553_v39 = vmul.f32 %v1123_v38, %v549_v41 }
 0x205   : > { %558 = vadd.xlane.f32.xlu1 %v557_v0 }
 0x213   : > { %594 = vperm.xlu0 %1106, %v1117_v22  }
 0x216   : > { %589 = vperm.xlu1 %1107, %v1119_v23  }
 0x21a   : > { %599 = vperm.xlu1 %1107, %v1121_v24  }
 0x282   : > { %v562_v28 = vpop.xlane.xlu1 %561 }
 0x283   : > { %v570_v30 = vadd.f32 %v562_v28, %v554_v27 }
 0x285   : > { %575 = vst.msk [vmem:[#allocation3 + $0x8] sm:$0xff] %vm274_vm2, %v570_v30 }
 0x286   : > { %v565_v32 = vpop.xlane.xlu0 %564 }
 0x287   : > { %v571_v34 = vadd.f32 %v565_v32, %v555_v31 }
 0x289   : > { %576 = vst.msk [vmem:[#allocation3 + $0x10] sm:$0xff] %vm274_vm2, %v571_v34 }
 0x28a   : > { %v568_v40 = vpop.xlane.xlu1 %567 }
 0x28b   : > { %v572_v35 = vadd.f32 %v568_v40, %v556_v36 }
 0x28c   : > { %v815_v37 = vld [vmem:[#allocation3 + $0x8] sm:$0xff] }
 0x28d   : > { %577 = vst.msk [vmem:[#allocation3 + $0x18] sm:$0xff] %vm274_vm2, %v572_v35  ;;  %1124 = vrcp.f32 %v815_v37 }
 0x28e   : > { %v559_v42 = vpop.xlane.xlu1 %558  ;;  %v595_v55 = vpop.permute.xlu0 %594 }
 0x28f   : > { %v569_v43 = vadd.f32 %v559_v42, %v553_v39  ;;  %v604_v63 = vmul.f32 %v595_v55, %v580_v57 }
 0x290   : > { %v816_v44 = vld [vmem:[#allocation3 + $0x10] sm:$0xff] }
 0x291   : > { %574 = vst.msk [vmem:[#allocation3] sm:$0xff] %vm274_vm2, %v569_v43  ;;  %1126 = vrcp.f32 %v816_v44 }
 0x292   : > { %v590_v52 = vpop.permute.xlu1 %589 }
 0x293   : > { %v603_v56 = vmul.f32 %v590_v52, %v579_v51 }
 0x294   : > { %v817_v45 = vld [vmem:[#allocation3 + $0x18] sm:$0xff] }
 0x295   : > { %1128 = vrcp.f32 %v817_v45 }
 0x296   : > { %v600_v1 = vpop.permute.xlu1 %599 }
 0x297   : > { %v605_v8 = vmul.f32 %v600_v1, %v581_v2 }
 0x298   : > { %v814_v46 = vld [vmem:[#allocation3] sm:$0xff] }
 0x299   : > { %1130 = vrcp.f32 %v814_v46 }
 0x29a   : > { %v1125_v47 = vpop.eup %1124 }
 0x29b   : > { %829 = vperm.xlu1 %1107, %v1125_v47  }
 0x29e   : > { %v1127_v48 = vpop.eup %1126 }
 0x29f   : > { %834 = vperm.xlu1 %1107, %v1127_v48  }
 0x2a2   : > { %v1129_v49 = vpop.eup %1128 }
 0x2a3   : > { %584 = vperm.xlu1 %1107, %v1123_v38   ;;  %839 = vperm.xlu0 %1106, %v1129_v49  }
 0x2a6   : > { %v1131_v50 = vpop.eup %1130 }
 0x2a7   : > { %824 = vperm.xlu0 %1106, %v1131_v50  }
 0x2b6   : > { %v651_v53 = vpop.f32.mrf.mxu0 }
 0x2b8   : > { %v1055_v54 = vpop.f32.mrf.mxu0 }
 0x2ba   : > { %v654_v58 = vpop.f32.mrf.mxu0  ;;  %v697_v59 = vpop.f32.mrf.mxu1 }
 0x2bb   : > { %v796_v60 = vadd.f32 %v697_v59, %v603_v56 }
 0x2bc   : > { %v1056_v61 = vpop.f32.mrf.mxu0  ;;  %v1061_v62 = vpop.f32.mrf.mxu1 }
 0x2bd   : > { %800 = vst.msk [vmem:[#allocation4 + $0x8] sm:$0xff] %vm283_vm0, %v796_v60 }
 0x2be   : > { %v700_v3 = vpop.f32.mrf.mxu1  ;;  %v743_v4 = vpop.f32.mrf.mxu0 }
 0x2bf   : > { %v797_v5 = vadd.f32 %v743_v4, %v604_v63 }
 0x2c0   : > { %v1062_v6 = vpop.f32.mrf.mxu1  ;;  %v1067_v7 = vpop.f32.mrf.mxu0 }
 0x2c1   : > { %801 = vst.msk [vmem:[#allocation4 + $0x10] sm:$0xff] %vm283_vm0, %v797_v5 }
 0x2c2   : > { %v746_v9 = vpop.f32.mrf.mxu0  ;;  %v789_v10 = vpop.f32.mrf.mxu1 }
 0x2c3   : > { %v798_v11 = vadd.f32 %v789_v10, %v605_v8 }
 0x2c4   : > { %v1068_v12 = vpop.f32.mrf.mxu0  ;;  %v1073_v13 = vpop.f32.mrf.mxu1  ;;  %v811_v16 = vld [vmem:[#allocation4 + $0x8] sm:$0xff] }
 0x2c5   : > { %802 = vst.msk [vmem:[#allocation4 + $0x18] sm:$0xff] %vm283_vm0, %v798_v11 }
 0x2c6   : > { %v792_v14 = vpop.f32.mrf.mxu1 }
 0x2c8   : > { %v1074_v15 = vpop.f32.mrf.mxu1  ;;  %v812_v20 = vld [vmem:[#allocation4 + $0x10] sm:$0xff] }
 0x2cc   : > { %v813_v23 = vld [vmem:[#allocation4 + $0x18] sm:$0xff] }
 0x316   : > { %v830_v17 = vpop.permute.xlu1 %829 }
 0x317   : > { %v843_v18 = vmul.f32 %v830_v17, %v811_v16 }
 0x319   : > { %847 = vrot.lane.b32.xlu1 %v843_v18, %s1160_s26 }
 0x31a   : > { %v835_v19 = vpop.permute.xlu1 %834 }
 0x31b   : > { %v844_v0 = vmul.f32 %v835_v19, %v812_v20 }
 0x31d   : > { %851 = vrot.lane.b32.xlu0 %v844_v0, %s1161_s27 }
 0x31e   : > { %v840_v22 = vpop.permute.xlu0 %839  ;;  %v585_v24 = vpop.permute.xlu1 %584 }
 0x31f   : > { %v845_v25 = vmul.f32 %v840_v22, %v813_v23  ;;  %v602_v26 = vmul.f32 %v585_v24, %v578_v21 }
 0x321   : > { %v795_v27 = vadd.f32 %v651_v53, %v602_v26  ;;  %855 = vrot.lane.b32.xlu1 %v845_v25, %s1162_s28 }
 0x322   : > { %v825_v28 = vpop.permute.xlu0 %824 }
 0x323   : > { %799 = vst.msk [vmem:[#allocation4] sm:$0xff] %vm283_vm0, %v795_v27 }
 0x32a   : > { %v810_v29 = vld [vmem:[#allocation4] sm:$0xff] }
 0x32b   : > { %v842_v31 = vmul.f32 %v825_v28, %v810_v29 }
 0x38b   : > { %v848_v30 = vpop.permute.xlu1 %847 }
 0x38c   : > { %v858_v33 = vsel %vm283_vm0, %v842_v31, %v848_v30 }
 0x38f   : > { %v852_v32 = vpop.permute.xlu0 %851 }
 0x390   : > { %v860_v34 = vsel %vm859_vm4, %v858_v33, %v852_v32 }
 0x393   : > { %v856_v36 = vpop.permute.xlu1 %855 }
 0x394   : > { %v862_v38 = vsel %vm861_vm5, %v860_v34, %v856_v36 }
 0x395   : > { %v863_v40 = vpack.c.bf16 %v862_v38, %v862_v38 }
 0x397   : > { %v867_v41 = vsel %vm864_vm6, %v863_v40, 0 }
 0x398   : > { %869 = vst [vmem:[%s268_s5] sm:$0xf] %v867_v41 }
 0x399 PF: > { %s13_s14 = sadd.s32 1, %s1154_s14   ;;  %s1360_s12 = smov %s1150_s13 }
 0x39a   : > { %p10_p5 = scmp.ge.s32.totalorder %s13_s14, 4   ;;  %s1361_s13 = smov %s1363_s15 }
 0x39c   :  { %12 = sbr.rel (!%p10_p5) target bundleno = 2 (0x2), region = 76 }

// kernel: _forward.3
= control target key start
LH: loop header
LB: loop body
LE: loop exit
PB: predicated region body
PF: predicated region fallthrough
CT: control target
= control target key end

     0   :  { %s1229_s27 = smov 0   ;;  %s1231_s28 = smov 0   ;;  %s1404_s0 = inlined_call_operand.vmem [shape: f32[2,8,128], index: 0, kind: input, shape index: {}]   ;;  %s1405_s1 = inlined_call_operand.vmem [shape: f32[1,128], index: 1, kind: input, shape index: {}]   ;;  %s1406_s2 = inlined_call_operand.vmem [shape: f32[1,128], index: 2, kind: input, shape index: {}]   ;;  %s1407_s3 = inlined_call_operand.vmem [shape: bf16[128,32], index: 3, kind: input, shape index: {}]   ;;  %s1408_s4 = inlined_call_operand.vmem [shape: bf16[128,32], index: 4, kind: input, shape index: {}]   ;;  %s1409_s5 = inlined_call_operand.vmem [shape: bf16[128,32], index: 5, kind: input, shape index: {}]   ;;  %s1410_s6 = inlined_call_operand.vmem [shape: bf16[2,4,8,8], index: 6, kind: output, shape index: {0}]   ;;  %s1411_s7 = inlined_call_operand.vmem [shape: bf16[2,4,8,8], index: 7, kind: output, shape index: {1}]   ;;  %s1412_s8 = inlined_call_operand.vmem [shape: bf16[2,4,8,8], index: 8, kind: output, shape index: {2}]  }
   0x1   :  { %s1233_s29 = smov 0  }
   0x2 LB: > { %s31_s30 = sadd.s32 1, %s1173_s28  ;;  %p959_p0 = scmp.ge.s32.totalorder %s1177_s29, 1  ;;  %s1177_s29 = sphi %s1233_s29, %s19_s29   ;;  %s1173_s28 = sphi %s1231_s28, %s1414_s28   ;;  %s1169_s27 = sphi %s1229_s27, %s1413_s27  }
   0x3   : > { %p33_p1 = scmp.ge.s32.totalorder %s31_s30, 2  ;;  %p289_p2 = scmp.lt.s32.totalorder %s1177_s29, 3 }
   0x5   : > { %s1416_s30 = smov (%p33_p1, %s31_s30), 0  ;;  %p290_p3 = pnand %p959_p0, %p289_p2 }
   0x6   : > { %p344_p4 = scmp.lt.s32.totalorder (!%p290_p3), %s1169_s27, 1  ;;  %s1182_s18 = smov (!%p290_p3), 112  }
   0x7   : > { %293 = sbr.rel (%p290_p3) target bundleno = 673 (0x2a1), region = 44  ;;  %s1183_s19 = smov (!%p290_p3), 104  }
   0xc   : > { %s1418_s27 = smov (!%p344_p4, %s1169_s27), 1  ;;  %v1129_v1 = vld [vmem:[%s1407_s3 + $0x38] sm:$0xff]   ;;  %v1179_v3 = vmov 0.0   ;;  %v1131_v8 = vld [vmem:[%s1407_s3 + $0x30] sm:$0xff]   ;;  %v1133_v10 = vld [vmem:[%s1407_s3 + $0x28] sm:$0xff]   ;;  %vm1180_vm0 = vmmov 0  }
   0xd   : > { %s960_s9 = sshll.u32 %s1418_s27, 3  ;;  %v1130_v2 = vld [vmem:[%s1408_s4 + $0x38] sm:$0xff]   ;;  %1040 = vmatprep.subr.bf16.mxu0 %v1179_v3  ;;  %1060 = vmatprep.subr.bf16.mxu1 %v1179_v3  ;;  %v1132_v9 = vld [vmem:[%s1408_s4 + $0x30] sm:$0xff]   ;;  %v1134_v11 = vld [vmem:[%s1408_s4 + $0x28] sm:$0xff]   ;;  %s1007_s11 = sshll.u32 %s1418_s27, 4  ;;  %vm723_vm1 = vcmask 60416  }
   0xe   : > { %s350_s12 = scalar_lea.vmem %s1404_s0, %s960_s9  ;;  %1041 = vmatpush3.bf16.msra.mxu0 %v1129_v1  ;;  %1061 = vmatpush3.bf16.msra.mxu1 %v1130_v2  ;;  %v1135_v12 = vld [vmem:[%s1407_s3 + $0x20] sm:$0xff]   ;;  %v1137_v14 = vld [vmem:[%s1407_s3 + $0x18] sm:$0xff]   ;;  %v1139_v16 = vld [vmem:[%s1407_s3 + $0x10] sm:$0xff]   ;;  %s1365_s14 = scalar_lea.vmem %s1410_s6, %s1007_s11 }
   0xf   : > { %v376_v0 = vld [vmem:[%s350_s12] sm:$0xff]  ;;  %1042 = vmatprep.subr.bf16.mxu0 %v1179_v3  ;;  %1062 = vmatprep.subr.bf16.mxu1 %v1179_v3  ;;  %v1138_v15 = vld [vmem:[%s1408_s4 + $0x18] sm:$0xff]   ;;  %v1140_v17 = vld [vmem:[%s1408_s4 + $0x10] sm:$0xff]   ;;  %s1370_s17 = scalar_lea.vmem %s1411_s7, %s1007_s11  ;;  %s1181_s27 = smov 120  }
  0x10   : > { %379 = vadd.xlane.f32.xlu0 %v376_v0  ;;  %v1136_v13 = vld [vmem:[%s1408_s4 + $0x20] sm:$0xff]   ;;  %1056 = vmatprep.mubr.msk.bf16.mxu0 %vm1180_vm0, %v1179_v3  ;;  %v1141_v18 = vld [vmem:[%s1407_s3 + $0x8] sm:$0xff]   ;;  %v1145_v34 = vld [vmem:[%s1409_s5 + $0x38] sm:$0xff]   ;;  %s374_s22 = scalar_lea.vmem %s1412_s8, %s1007_s11 }
  0x11   : > { %1076 = vmatprep.mubr.msk.bf16.mxu1 %vm1180_vm0, %v1179_v3  ;;  %v1142_v19 = vld [vmem:[%s1408_s4 + $0x8] sm:$0xff]   ;;  %v1143_v20 = vld [vmem:[%s1407_s3] sm:$0xff]   ;;  %v1146_v36 = vld [vmem:[%s1409_s5 + $0x30] sm:$0xff]  }
  0x12   : > { %1043 = vmatpush3.bf16.msra.mxu0 %v1131_v8  ;;  %1063 = vmatpush3.bf16.msra.mxu1 %v1132_v9  ;;  %v1144_v21 = vld [vmem:[%s1408_s4] sm:$0xff]   ;;  %v1147_v37 = vld [vmem:[%s1409_s5 + $0x28] sm:$0xff]   ;;  %v1149_v39 = vld [vmem:[%s1409_s5 + $0x18] sm:$0xff]  }
  0x13   : > { %1044 = vmatprep.subr.bf16.mxu0 %v1179_v3  ;;  %1064 = vmatprep.subr.bf16.mxu1 %v1179_v3  ;;  %v967_v29 = vld [vmem:[%s1405_s1] ss:$0 sm:$0xff]  ;;  %v1150_v40 = vld [vmem:[%s1409_s5 + $0x10] sm:$0xff]   ;;  %v1151_v41 = vld [vmem:[%s1409_s5 + $0x8] sm:$0xff]  }
  0x14   : > { %v968_v31 = vld [vmem:[%s1406_s2] ss:$0 sm:$0xff] }
  0x15   : > { %v1148_v38 = vld [vmem:[%s1409_s5 + $0x20] sm:$0xff]  }
  0x16   : > { %1045 = vmatpush3.bf16.msra.mxu0 %v1133_v10  ;;  %1065 = vmatpush3.bf16.msra.mxu1 %v1134_v11  ;;  %v1152_v42 = vld [vmem:[%s1409_s5] sm:$0xff]  }
  0x17   : > { %1046 = vmatprep.subr.bf16.mxu0 %v1179_v3  ;;  %1066 = vmatprep.subr.bf16.mxu1 %v1179_v3 }
  0x1a   : > { %1047 = vmatpush3.bf16.msra.mxu0 %v1135_v12  ;;  %1067 = vmatpush3.bf16.msra.mxu1 %v1136_v13 }
  0x1b   : > { %1048 = vmatprep.subr.bf16.mxu0 %v1179_v3  ;;  %1068 = vmatprep.subr.bf16.mxu1 %v1179_v3 }
  0x1e   : > { %1049 = vmatpush3.bf16.msra.mxu0 %v1137_v14  ;;  %1069 = vmatpush3.bf16.msra.mxu1 %v1138_v15 }
  0x1f   : > { %1050 = vmatprep.subr.bf16.mxu0 %v1179_v3  ;;  %1070 = vmatprep.subr.bf16.mxu1 %v1179_v3 }
  0x22   : > { %1051 = vmatpush3.bf16.msra.mxu0 %v1139_v16  ;;  %1071 = vmatpush3.bf16.msra.mxu1 %v1140_v17 }
  0x23   : > { %1052 = vmatprep.subr.bf16.mxu0 %v1179_v3  ;;  %1072 = vmatprep.subr.bf16.mxu1 %v1179_v3 }
  0x26   : > { %1053 = vmatpush3.bf16.msra.mxu0 %v1141_v18  ;;  %1073 = vmatpush3.bf16.msra.mxu1 %v1142_v19 }
  0x27   : > { %1054 = vmatprep.subr.bf16.mxu0 %v1179_v3  ;;  %1074 = vmatprep.subr.bf16.mxu1 %v1179_v3 }
  0x2a   : > { %1055 = vmatpush3.bf16.msra.mxu0 %v1143_v20  ;;  %1075 = vmatpush3.bf16.msra.mxu1 %v1144_v21 }
  0x2b   : > { %1080 = vmatprep.subr.bf16.mxu0 %v1179_v3 }
  0x99   : > { %v380_v4 = vpop.xlane.xlu0 %379 }
  0x9a   : > { %v381_v5 = vmul.f32 0.03125, %v380_v4 }
  0x9c   : > { %v382_v6 = vsub.f32 %v376_v0, %v381_v5  ;;  %v386_v22 = vmul.f32 %v381_v5, %v381_v5 }
  0x9e   : > { %v383_v7 = vmul.f32 %v382_v6, %v382_v6  ;;  %v387_v23 = vmul.f32 96.0, %v386_v22 }
  0xa0   : > { %384 = vadd.xlane.f32.xlu0 %v383_v7 }
 0x129   : > { %v385_v24 = vpop.xlane.xlu0 %384 }
 0x12a   : > { %v388_v25 = vsub.f32 %v385_v24, %v387_v23 }
 0x12c   : > { %v389_v26 = vmul.f32 0.03125, %v388_v25 }
 0x12e   : > { %v390_v27 = vadd.f32 1e-05, %v389_v26 }
 0x130   : > { %1153 = vrsqrt.f32 %v390_v27 }
 0x13d   : > { %v1154_v28 = vpop.eup %1153 }
 0x13e   : > { %v392_v30 = vmul.f32 %v1154_v28, %v382_v6 }
 0x140   : > { %v399_v32 = vmul.f32 %v967_v29, %v392_v30 }
 0x142   : > { %v406_v33 = vadd.f32 %v968_v31, %v399_v32 }
 0x144   : > { %v407_v35 = vpack.c.bf16 %v406_v33, %v406_v33 }
 0x146   : > { %1057 = vmatmul.mubr.bf16.vlgmr.msra.gmra.mxu0 %v407_v35  ;;  %1077 = vmatmul.mubr.bf16.vlgmr.msra.gmra.mxu1 %v407_v35 }
 0x147   : > { %1081 = vmatpush3.bf16.msra.mxu0 %v1145_v34  ;;  %1096 = vmatprep.mubr.msk.bf16.mxu0 %vm1180_vm0, %v1179_v3 }
 0x148   : > { %1082 = vmatprep.subr.bf16.mxu0 %v1179_v3 }
 0x14b   : > { %1083 = vmatpush3.bf16.msra.mxu0 %v1146_v36 }
 0x14c   : > { %1084 = vmatprep.subr.bf16.mxu0 %v1179_v3 }
 0x14f   : > { %1085 = vmatpush3.bf16.msra.mxu0 %v1147_v37 }
 0x150   : > { %1086 = vmatprep.subr.bf16.mxu0 %v1179_v3 }
 0x153   : > { %1087 = vmatpush3.bf16.msra.mxu0 %v1148_v38 }
 0x154   : > { %1088 = vmatprep.subr.bf16.mxu0 %v1179_v3 }
 0x157   : > { %1089 = vmatpush3.bf16.msra.mxu0 %v1149_v39 }
 0x158   : > { %1090 = vmatprep.subr.bf16.mxu0 %v1179_v3 }
 0x15b   : > { %1091 = vmatpush3.bf16.msra.mxu0 %v1150_v40 }
 0x15c   : > { %1092 = vmatprep.subr.bf16.mxu0 %v1179_v3 }
 0x15f   : > { %1093 = vmatpush3.bf16.msra.mxu0 %v1151_v41 }
 0x160   : > { %1094 = vmatprep.subr.bf16.mxu0 %v1179_v3 }
 0x163   : > { %1095 = vmatpush3.bf16.msra.mxu0 %v1152_v42 }
 0x166   : > { %1097 = vmatmul.mubr.bf16.vlgmr.msra.gmra.mxu0 %v407_v35 }
 0x206   : > { %v506_v43 = vpop.f32.mrf.mxu0  ;;  %v610_v44 = vpop.f32.mrf.mxu1 }
 0x207   : > { %v720_v45 = vpack.c.bf16 %v506_v43, %v506_v43  ;;  %v721_v46 = vpack.c.bf16 %v610_v44, %v610_v44 }
 0x208   : > { %v1058_v47 = vpop.f32.mrf.mxu0  ;;  %v1078_v48 = vpop.f32.mrf.mxu1 }
 0x209   : > { %730 = vrot.lane.b32.xlu1 %v720_v45, %s1181_s27  ;;  %724 = vst.msk [vmem:[%s1365_s14] sm:$0xf] %vm723_vm1, %v720_v45  ;;  %725 = vst.msk [vmem:[%s1370_s17] sm:$0xf] %vm723_vm1, %v721_v46 }
 0x20a   : > { %v509_v49 = vpop.f32.mrf.mxu0  ;;  %v613_v50 = vpop.f32.mrf.mxu1 }
 0x20c   : > { %v1059_v51 = vpop.f32.mrf.mxu0  ;;  %v1079_v52 = vpop.f32.mrf.mxu1 }
 0x20d   : > { %738 = vrot.lane.b32.xlu1 %v721_v46, %s1181_s27 }
 0x211   : > { %751 = vrot.lane.b32.xlu1 %v720_v45, %s1182_s18 }
 0x215   : > { %756 = vrot.lane.b32.xlu1 %v721_v46, %s1182_s18 }
 0x219   : > { %766 = vrot.lane.b32.xlu1 %v720_v45, %s1183_s19 }
 0x21d   : > { %771 = vrot.lane.b32.xlu1 %v721_v46, %s1183_s19 }
 0x226   : > { %v714_v53 = vpop.f32.mrf.mxu0 }
 0x227   : > { %v722_v54 = vpack.c.bf16 %v714_v53, %v714_v53 }
 0x228   : > { %v1098_v55 = vpop.f32.mrf.mxu0 }
 0x229   : > { %761 = vrot.lane.b32.xlu1 %v722_v54, %s1182_s18  ;;  %746 = vrot.lane.b32.xlu0 %v722_v54, %s1181_s27  ;;  %726 = vst.msk [vmem:[%s374_s22] sm:$0xf] %vm723_vm1, %v722_v54 }
 0x22a   : > { %v717_v56 = vpop.f32.mrf.mxu0 }
 0x22c   : > { %v1099_v57 = vpop.f32.mrf.mxu0 }
 0x22d   : > { %776 = vrot.lane.b32.xlu1 %v722_v54, %s1183_s19 }
 0x27b   : > { %v731_v58 = vpop.permute.xlu1 %730 }
 0x27c   : > { %994 = vst.msk [vmem:[%s1365_s14 + $0x4] sm:$0xf] %vm723_vm1, %v731_v58 }
 0x27f   : > { %v739_v59 = vpop.permute.xlu1 %738 }
 0x280   : > { %996 = vst.msk [vmem:[%s1370_s17 + $0x4] sm:$0xf] %vm723_vm1, %v739_v59 }
 0x283   : > { %v752_v60 = vpop.permute.xlu1 %751 }
 0x284   : > { %999 = vst.msk [vmem:[%s1365_s14 + $0x8] sm:$0xf] %vm723_vm1, %v752_v60 }
 0x287   : > { %v757_v61 = vpop.permute.xlu1 %756 }
 0x288   : > { %1000 = vst.msk [vmem:[%s1370_s17 + $0x8] sm:$0xf] %vm723_vm1, %v757_v61 }
 0x28b   : > { %v767_v62 = vpop.permute.xlu1 %766 }
 0x28c   : > { %1002 = vst.msk [vmem:[%s1365_s14 + $0xc] sm:$0xf] %vm723_vm1, %v767_v62 }
 0x28f   : > { %v772_v63 = vpop.permute.xlu1 %771 }
 0x290   : > { %1003 = vst.msk [vmem:[%s1370_s17 + $0xc] sm:$0xf] %vm723_vm1, %v772_v63 }
 0x29b   : > { %v762_v0 = vpop.permute.xlu1 %761  ;;  %v747_v1 = vpop.permute.xlu0 %746 }
 0x29c   : > { %1001 = vst.msk [vmem:[%s374_s22 + $0x8] sm:$0xf] %vm723_vm1, %v762_v0  ;;  %998 = vst.msk [vmem:[%s374_s22 + $0x4] sm:$0xf] %vm723_vm1, %v747_v1 }
 0x29f   : > { %v777_v2 = vpop.permute.xlu1 %776 }
 0x2a0   : > { %1004 = vst.msk [vmem:[%s374_s22 + $0xc] sm:$0xf] %vm723_vm1, %v777_v2 }
 0x2a1 PF: > { %s19_s29 = sadd.s32 1, %s1177_s29   ;;  %s1413_s27 = smov %s1173_s28 }
 0x2a2   : > { %p16_p5 = scmp.ge.s32.totalorder %s19_s29, 4   ;;  %s1414_s28 = smov %s1416_s30 }
 0x2a4   :  { %18 = sbr.rel (!%p16_p5) target bundleno = 2 (0x2), region = 107 }

// kernel: _forward.5
= control target key start
LH: loop header
LB: loop body
LE: loop exit
PB: predicated region body
PF: predicated region fallthrough
CT: control target
= control target key end

     0   :  { %s1464_s0 = inlined_call_operand.vmem [shape: f32[2,8,128], index: 0, kind: input, shape index: {}]   ;;  %s1465_s1 = inlined_call_operand.vmem [shape: bf16[2,8,128], index: 1, kind: input, shape index: {}]   ;;  %s1466_s2 = inlined_call_operand.vmem [shape: bf16[128,128], index: 2, kind: input, shape index: {}]   ;;  %s1467_s3 = inlined_call_operand.vmem [shape: f32[1,128], index: 3, kind: input, shape index: {}]   ;;  %s1468_s4 = inlined_call_operand.vmem [shape: f32[1,128], index: 4, kind: input, shape index: {}]   ;;  %s1469_s5 = inlined_call_operand.vmem [shape: f32[1,128], index: 5, kind: input, shape index: {}]   ;;  %s1470_s6 = inlined_call_operand.vmem [shape: bf16[128,128], index: 6, kind: input, shape index: {}]   ;;  %s1471_s7 = inlined_call_operand.vmem [shape: f32[1,128], index: 7, kind: input, shape index: {}]   ;;  %s1472_s8 = inlined_call_operand.vmem [shape: bf16[128,128], index: 8, kind: input, shape index: {}]   ;;  %s1473_s9 = inlined_call_operand.vmem [shape: f32[1,128], index: 9, kind: input, shape index: {}]   ;;  %s1474_s10 = inlined_call_operand.hbm [shape: f32[2,8,128], index: 10, kind: output, shape index: {}]  }
   0x1   :  { %1475 = sst [smem:[#allocation5_spill]] %s1466_s2 }
   0x2   :  { %15 = vsyncpa [#allocation3], 0 }
   0x3   :  { %17 = vsyncpa [#allocation3 + $0x1], 0  ;;  %s1228_s13 = smov 0   ;;  %s1230_s14 = smov 0  }
   0x4   :  { %s1232_s15 = smov 0   ;;  %s1234_s16 = smov 0  }
   0x5   :  { %s1236_s17 = smov 0   ;;  %s1238_s18 = smov 0  }
   0x6 LB: > { %s881_s19 = sadd.s32 4294967295, %s1168_s18   ;;  %s882_s20 = sadd.s32 4294967294, %s1168_s18   ;;  %s1168_s18 = sphi %s1238_s18, %s23_s18   ;;  %s1164_s17 = sphi %s1236_s17, %s1483_s17   ;;  %s1160_s16 = sphi %s1234_s16, %s1482_s16   ;;  %s1156_s15 = sphi %s1232_s15, %s1481_s15   ;;  %s1152_s14 = sphi %s1230_s14, %s1480_s14   ;;  %s1148_s13 = sphi %s1228_s13, %s1479_s13  }
   0x7   : > { %s35_s21 = sadd.s32 1, %s1164_s17  ;;  %s268_s22 = sadd.s32 1, %s1156_s15 }
   0x8   : > { %p37_p0 = scmp.ge.s32.totalorder %s35_s21, 2  ;;  %p278_p1 = scmp.ne.s32.totalorder %s1156_s15, %s1152_s14 }
   0x9   : > { %p279_p2 = scmp.eq.s32.totalorder %s881_s19, 1  ;;  %p284_p3 = scmp.ne.s32.totalorder %s1152_s14, %s1148_s13 }
   0xa   : > { %s1485_s21 = smov (%p37_p0, %s35_s21), 0  ;;  %p285_p5 = scmp.eq.s32.totalorder %s882_s20, 1 }
   0xb   : > { %p1268_p4 = por %p279_p2, %p278_p1  ;;  %s263_s24 = ssub.s32 %s1164_s17, %s1485_s21 }
   0xc   : > { %p885_p6 = scmp.ge.s32.totalorder %s1168_s18, 1  ;;  %p266_p7 = scmp.eq.s32.totalorder %s263_s24, 0 }
   0xd   : > { %p1275_p8 = por %p285_p5, %p284_p3  ;;  %p347_p9 = scmp.lt.s32.totalorder %s1168_s18, 3 }
   0xe   : > { %s1281_s26 = scalar_select %p266_p7, %s1156_s15, %s268_s22  }
   0xf   : > { %p348_p10 = pnand %p885_p6, %p347_p9 }
  0x10   : > { %s1478_s2 = sld [smem:[#allocation5_spill]] (!%p348_p10)  ;;  %p394_p11 = scmp.lt.s32.totalorder (!%p348_p10), %s1160_s16, 1 }
  0x11   : > { %351 = sbr.rel (%p348_p10) target bundleno = 972 (0x3cc), region = 60 }
  0x16   : > { %v1066_v0 = vld [vmem:[%s1478_s2 + $0x38] sm:$0xff]   ;;  %v1170_v1 = vmov 0.0   ;;  %v1067_v2 = vld [vmem:[%s1478_s2 + $0x30] sm:$0xff]   ;;  %vm1171_vm0 = vmmov 0   ;;  %v1068_v3 = vld [vmem:[%s1478_s2 + $0x28] sm:$0xff]   ;;  %s395_s29 = scalar_select %p394_p11, %s1160_s16, 1 }
  0x17   : > { %949 = vmatprep.subr.bf16.mxu0 %v1170_v1  ;;  %969 = vmatprep.subr.bf16.mxu1 %v1170_v1  ;;  %v1069_v4 = vld [vmem:[%s1478_s2 + $0x20] sm:$0xff]   ;;  %v1070_v5 = vld [vmem:[%s1478_s2 + $0x18] sm:$0xff]   ;;  %v1071_v6 = vld [vmem:[%s1478_s2 + $0x10] sm:$0xff]  }
  0x18   : > { %950 = vmatpush3.bf16.msra.mxu0 %v1066_v0  ;;  %965 = vmatprep.mubr.msk.bf16.mxu0 %vm1171_vm0, %v1170_v1  ;;  %v1072_v7 = vld [vmem:[%s1478_s2 + $0x8] sm:$0xff]   ;;  %s888_s12 = sshll.u32 %s395_s29, 2  ;;  %v1073_v8 = vld [vmem:[%s1478_s2] sm:$0xff]   ;;  %s887_s28 = sshll.u32 %s395_s29, 3  ;;  %v1074_v18 = vld [vmem:[%s1470_s6 + $0x38] sm:$0xff]  }
  0x19   : > { %951 = vmatprep.subr.bf16.mxu0 %v1170_v1  ;;  %985 = vmatprep.mubr.msk.bf16.mxu1 %vm1171_vm0, %v1170_v1  ;;  %s407_s27 = scalar_lea.vmem %s1465_s1, %s888_s12  ;;  %s400_s19 = scalar_lea.vmem %s1464_s0, %s887_s28  ;;  %v889_v10 = vld [vmem:[%s1467_s3] ss:$0 sm:$0xff]  ;;  %v1075_v23 = vld [vmem:[%s1470_s6 + $0x30] sm:$0xff]   ;;  %v1076_v24 = vld [vmem:[%s1470_s6 + $0x28] sm:$0xff]  }
  0x1a   : > { %v410_v9 = vld [vmem:[%s407_s27] sm:$0xf]  ;;  %970 = vmatpush3.bf16.msra.mxu1 %v1074_v18  ;;  %v1078_v26 = vld [vmem:[%s1470_s6 + $0x18] sm:$0xff]   ;;  %v1079_v27 = vld [vmem:[%s1470_s6 + $0x10] sm:$0xff]   ;;  %s391_s27 = sand.u32 1, %s1152_s14  }
  0x1b   : > { %v409_v11 = vld [vmem:[%s400_s19] sm:$0xff]  ;;  %971 = vmatprep.subr.bf16.mxu1 %v1170_v1  ;;  %v1080_v28 = vld [vmem:[%s1470_s6 + $0x8] sm:$0xff]   ;;  %v1082_v30 = vld [vmem:[%s1472_s8 + $0x38] sm:$0xff]   ;;  %s886_s28 = sshll.u32 %s391_s27, 3  ;;  %s919_s19 = sshll.u32 %s1160_s16, 7 }
  0x1c   : > { %952 = vmatpush3.bf16.msra.mxu0 %v1067_v2  ;;  %v1077_v25 = vld [vmem:[%s1470_s6 + $0x20] sm:$0xff]   ;;  %v1083_v31 = vld [vmem:[%s1472_s8 + $0x30] sm:$0xff]   ;;  %v1084_v32 = vld [vmem:[%s1472_s8 + $0x28] sm:$0xff]   ;;  %s393_s20 = scalar_lea.vmem [#allocation2], %s886_s28  ;;  %s1418_s22 = scalar_lea.hbm %s1474_s10, %s919_s19 }
  0x1d   : > { %953 = vmatprep.subr.bf16.mxu0 %v1170_v1  ;;  %v1081_v29 = vld [vmem:[%s1470_s6] sm:$0xff]   ;;  %v1086_v34 = vld [vmem:[%s1472_s8 + $0x18] sm:$0xff]   ;;  %v1087_v35 = vld [vmem:[%s1472_s8 + $0x10] sm:$0xff]   ;;  %s795_s12 = sshll.u32 %s393_s20, 4  ;;  %s781_s16 = scalar_lea.sflag [#allocation3], %s391_s27  ;;  %s1420_s12 = int_to_ptr.vmem [resolvable:$true] %s795_s12 }
  0x1e   : > { %972 = vmatpush3.bf16.msra.mxu1 %v1075_v23  ;;  %v1085_v33 = vld [vmem:[%s1472_s8 + $0x20] sm:$0xff]   ;;  %v1088_v49 = vld [vmem:[%s1472_s8 + $0x8] sm:$0xff]   ;;  %s1092_s24 = scalar_lea.vmem %s1420_s12, 128  ;;  %s1172_s28 = smov [#allocation2]  }
  0x1f   : > { %973 = vmatprep.subr.bf16.mxu1 %v1170_v1  ;;  %v898_v43 = vld [vmem:[%s1468_s4] ss:$0 sm:$0xff]  ;;  %p1093_p12 = scmp.ne.s32.totalorder %s1420_s12, %s1092_s24  ;;  %s1096_s30 = sshll.u32 %s1172_s28, 4  ;;  %s1097_s30 = int_to_ptr.vmem [resolvable:$false] %s1096_s30 }
  0x20   : > { %954 = vmatpush3.bf16.msra.mxu0 %v1068_v3  ;;  %v899_v45 = vld [vmem:[%s1469_s5] ss:$0 sm:$0xff]  ;;  %s1098_s11 = scalar_lea.vmem %s1097_s30, 256  ;;  %p1099_p1 = scmp.lt.s32.totalorder %s1420_s12, %s1097_s30 }
  0x21   : > { %955 = vmatprep.subr.bf16.mxu0 %v1170_v1  ;;  %v1089_v50 = vld [vmem:[%s1472_s8] sm:$0xff]   ;;  %p1094_p13 = pnand %p1093_p12, %p1268_p4  ;;  %p1100_p2 = scmp.lt.s32.totalorder %s1098_s11, %s1092_s24 }
  0x22   : > { %974 = vmatpush3.bf16.msra.mxu1 %v1076_v24  ;;  %v900_v51 = vld [vmem:[%s1471_s7] ss:$0 sm:$0xff] }
  0x23   : > { %975 = vmatprep.subr.bf16.mxu1 %v1170_v1  ;;  %v909_v59 = vld [vmem:[%s1473_s9] ss:$0 sm:$0xff]  ;;  %p1095_p0 = pneg %p1094_p13  ;;  %p1101_p3 = por %p1100_p2, %p1099_p1 }
  0x24   : > { %956 = vmatpush3.bf16.msra.mxu0 %v1069_v4 }
  0x25   : > { %957 = vmatprep.subr.bf16.mxu0 %v1170_v1  ;;  %p1102_p5 = pnand %p1101_p3, %p1095_p0 }
  0x26   : > { %976 = vmatpush3.bf16.msra.mxu1 %v1077_v25 }
  0x27   : > { %977 = vmatprep.subr.bf16.mxu1 %v1170_v1 }
  0x28   : > { %958 = vmatpush3.bf16.msra.mxu0 %v1070_v5 }
  0x29   : > { %959 = vmatprep.subr.bf16.mxu0 %v1170_v1 }
  0x2a   : > { %978 = vmatpush3.bf16.msra.mxu1 %v1078_v26 }
  0x2b   : > { %979 = vmatprep.subr.bf16.mxu1 %v1170_v1 }
  0x2c   : > { %960 = vmatpush3.bf16.msra.mxu0 %v1071_v6 }
  0x2d   : > { %961 = vmatprep.subr.bf16.mxu0 %v1170_v1 }
  0x2e   : > { %980 = vmatpush3.bf16.msra.mxu1 %v1079_v27 }
  0x2f   : > { %981 = vmatprep.subr.bf16.mxu1 %v1170_v1 }
  0x30   : > { %962 = vmatpush3.bf16.msra.mxu0 %v1072_v7 }
  0x31   : > { %963 = vmatprep.subr.bf16.mxu0 %v1170_v1 }
  0x32   : > { %982 = vmatpush3.bf16.msra.mxu1 %v1080_v28 }
  0x33   : > { %983 = vmatprep.subr.bf16.mxu1 %v1170_v1 }
  0x34   : > { %964 = vmatpush3.bf16.msra.mxu0 %v1073_v8 }
  0x35   : > { %989 = vmatprep.subr.bf16.mxu0 %v1170_v1 }
  0x36   : > { %984 = vmatpush3.bf16.msra.mxu1 %v1081_v29 }
  0x37   : > { %966 = vmatmul.mubr.bf16.vlgmr.msra.gmra.mxu0 %v410_v9 }
  0x38   : > { %1005 = vmatprep.mubr.msk.bf16.mxu0 %vm1171_vm0, %v1170_v1  ;;  %990 = vmatpush3.bf16.msra.mxu0 %v1082_v30 }
  0x39   : > { %991 = vmatprep.subr.bf16.mxu0 %v1170_v1 }
  0x3c   : > { %992 = vmatpush3.bf16.msra.mxu0 %v1083_v31 }
  0x3d   : > { %993 = vmatprep.subr.bf16.mxu0 %v1170_v1 }
  0x40   : > { %994 = vmatpush3.bf16.msra.mxu0 %v1084_v32 }
  0x41   : > { %995 = vmatprep.subr.bf16.mxu0 %v1170_v1 }
  0x44   : > { %996 = vmatpush3.bf16.msra.mxu0 %v1085_v33 }
  0x45   : > { %997 = vmatprep.subr.bf16.mxu0 %v1170_v1 }
  0x48   : > { %998 = vmatpush3.bf16.msra.mxu0 %v1086_v34 }
  0x49   : > { %999 = vmatprep.subr.bf16.mxu0 %v1170_v1 }
  0x4c   : > { %1000 = vmatpush3.bf16.msra.mxu0 %v1087_v35 }
  0x4d   : > { %1001 = vmatprep.subr.bf16.mxu0 %v1170_v1 }
  0x50   : > { %1002 = vmatpush3.bf16.msra.mxu0 %v1088_v49 }
  0x51   : > { %1003 = vmatprep.subr.bf16.mxu0 %v1170_v1 }
  0x54   : > { %1004 = vmatpush3.bf16.msra.mxu0 %v1089_v50 }
  0xf7   : > { %v516_v12 = vpop.f32.mrf.mxu0 }
  0xf8   : > { %v517_v13 = vadd.f32 %v889_v10, %v516_v12 }
  0xf9   : > { %v967_v14 = vpop.f32.mrf.mxu0 }
  0xfa   : > { %v1334_v15 = vadd.f32 %v517_v13, %v409_v11 }
  0xfb   : > { %v519_v16 = vpop.f32.mrf.mxu0 }
  0xfc   : > { %525 = vadd.xlane.f32.xlu0 %v1334_v15 }
  0xfd   : > { %v968_v17 = vpop.f32.mrf.mxu0 }
 0x185   : > { %v526_v19 = vpop.xlane.xlu0 %525 }
 0x186   : > { %v527_v20 = vmul.f32 0.03125, %v526_v19 }
 0x188   : > { %v528_v21 = vsub.f32 %v1334_v15, %v527_v20  ;;  %v532_v36 = vmul.f32 %v527_v20, %v527_v20 }
 0x18a   : > { %v529_v22 = vmul.f32 %v528_v21, %v528_v21  ;;  %v533_v37 = vmul.f32 96.0, %v532_v36 }
 0x18c   : > { %530 = vadd.xlane.f32.xlu0 %v529_v22 }
 0x215   : > { %v531_v38 = vpop.xlane.xlu0 %530 }
 0x216   : > { %v534_v39 = vsub.f32 %v531_v38, %v533_v37 }
 0x218   : > { %v535_v40 = vmul.f32 0.03125, %v534_v39 }
 0x21a   : > { %v536_v41 = vadd.f32 1e-05, %v535_v40 }
 0x21c   : > { %1090 = vrsqrt.f32 %v536_v41 }
 0x229   : > { %v1091_v42 = vpop.eup %1090 }
 0x22a   : > { %v538_v44 = vmul.f32 %v1091_v42, %v528_v21 }
 0x22c   : > { %v545_v46 = vmul.f32 %v898_v43, %v538_v44 }
 0x22e   : > { %v552_v47 = vadd.f32 %v899_v45, %v545_v46 }
 0x230   : > { %v553_v48 = vpack.c.bf16 %v552_v47, %v552_v47 }
 0x232   : > { %986 = vmatmul.mubr.bf16.vlgmr.msra.gmra.mxu1 %v553_v48 }
 0x2f2   : > { %v659_v52 = vpop.f32.mrf.mxu1 }
 0x2f3   : > { %v660_v53 = vadd.f32 %v900_v51, %v659_v52 }
 0x2f4   : > { %v987_v54 = vpop.f32.mrf.mxu1 }
 0x2f5   : > { %v665_v55 = vmax.f32 %v660_v53, 0.0 }
 0x2f6   : > { %v662_v56 = vpop.f32.mrf.mxu1 }
 0x2f7   : > { %v666_v57 = vpack.c.bf16 %v665_v55, %v665_v55 }
 0x2f8   : > { %v988_v58 = vpop.f32.mrf.mxu1 }
 0x2f9   : > { %1006 = vmatmul.mubr.bf16.vlgmr.msra.gmra.mxu0 %v666_v57 }
 0x3b9   : > { %v772_v60 = vpop.f32.mrf.mxu0 }
 0x3ba   : > { %v773_v61 = vadd.f32 %v909_v59, %v772_v60 }
 0x3bb   : > { %v1007_v62 = vpop.f32.mrf.mxu0 }
 0x3bc   : > { %v778_v63 = vadd.f32 %v773_v61, %v1334_v15 }
 0x3bd   : > { %v775_v0 = vpop.f32.mrf.mxu0 }
 0x3be   : > { %779 = vst [vmem:[%s393_s20] sm:$0xff] %v778_v63 }
 0x3bf   : > { %v1008_v1 = vpop.f32.mrf.mxu0 }
 0x3c0   : > { %1105 = shalt.err (!%p1102_p5)
}
 0x3c1   : > { %s1106_s19 = scalar_lea.hbm %s1418_s22, 128  ;;  %s1110_s29 = scalar_lea.hbm %s1474_s10, 256 }
 0x3c2   : > { %p1107_p6 = scmp.ne.s32.totalorder %s1418_s22, %s1106_s19  ;;  %p1111_p10 = scmp.lt.s32.totalorder %s1418_s22, %s1474_s10 }
 0x3c3   : > { %p1112_p11 = scmp.lt.s32.totalorder %s1110_s29, %s1106_s19 }
 0x3c4   : > { %p1108_p7 = pnand %p1107_p6, %p1268_p4 }
 0x3c5   : > { %p1113_p12 = por %p1112_p11, %p1111_p10 }
 0x3c6   : > { %p1109_p9 = pneg %p1108_p7 }
 0x3c8   : > { %p1114_p13 = pnand %p1113_p12, %p1109_p9 }
 0x3ca   : > { %1117 = shalt.err (!%p1114_p13)
}
 0x3cb   : > { %1009 = dma.vmem_to_hbm [thread:$0]  (%p1268_p4), %s1420_s12, 128, %s1418_s22, %s781_s16  }
 0x3cc PF: > { %p1015_p0 = scmp.ge.s32.totalorder %s1168_s18, 2  ;;  %s807_s24 = sand.u32 1, %s1148_s13  }
 0x3cd   : > { %s808_s30 = scalar_lea.sflag [#allocation3], %s807_s24 }
 0x3ce   : > { %p1012_p1 = pnand %p1015_p0, %p1275_p8 }
 0x3d0   : > { %p1013_p2 = pneg %p1012_p1 }
 0x3d2   : > { %1143 = dma.done.wait (%p1013_p2), %s808_s30, 128  }
 0x3d3   : > { %1145 = vsyncadd (%p1013_p2), %s808_s30, 4294967168  ;;  %s23_s18 = sadd.s32 1, %s1168_s18   ;;  %s1479_s13 = smov %s1152_s14 }
 0x3d4   : > { %p20_p3 = scmp.ge.s32.totalorder %s23_s18, 4   ;;  %s1480_s14 = smov %s1156_s15 }
 0x3d5   : > { %s1481_s15 = smov %s1281_s26  ;;  %s1482_s16 = smov %s1164_s17 }
 0x3d6   : > { %s1483_s17 = smov %s1485_s21  ;;  %22 = sbr.rel (!%p20_p3) target bundleno = 6 (0x6), region = 98 }
 0x3db   :  { %813 = vsyncpa [#allocation3], 1 }
 0x3dc   :  { %815 = vsyncpa [#allocation3 + $0x1], 1 }

</bundles_post_ra>
